<compile_context>
chip_gen: v7x
topology: tpu7x:2x2x1
jax: 0.10.0
libtpu: 0.0.40
codegen_flags: <defaults>
</compile_context>

<pallas_src>
import math
import functools

import jax
import jax.numpy as jnp
from jax.experimental import pallas as pl
from jax.experimental.pallas import tpu as pltpu


NUM_IMG_TOKENS = 257  # fixed CLIP-image token count in WanI2VCrossAttention
_VMEM_LIMIT = 64 * 1024 * 1024  # fits v7x (64 MiB physical) and below


def _round_up(v, m):
    return ((v + m - 1) // m) * m


def _pad_seq(x3d, l_pad):
    """Pad [B, L, C] -> [B, l_pad, C] with zeros along the sequence axis."""
    B, L, C = x3d.shape
    if l_pad == L:
        return x3d
    return jnp.pad(x3d, ((0, 0), (0, l_pad - L), (0, 0)))


def _pick_row_tile(M, desired):
    """Largest multiple of 128 that divides M and is <= desired."""
    t = (min(desired, M) // 128) * 128
    t = max(t, 128)
    while t > 128 and M % t != 0:
        t -= 128
    return t


def _pick_k_tile(K, desired):
    """Largest multiple of 128 that divides K and is <= desired."""
    t = (min(desired, K) // 128) * 128
    t = max(t, 128)
    while t > 128 and K % t != 0:
        t -= 128
    return t


# --------------------------------------------------------------------------
# Fused Linear + RMSNorm (+ optional output scale):
#   out = rmsnorm(x @ W + b) * gain * out_scale
# The full output width N stays resident (RMSNorm needs the whole row); the
# contraction axis is tiled and accumulated in an f32 VMEM scratch tile.
# x / W tiles are bf16 (MXU), bias/gain/epilogue stay f32.
# --------------------------------------------------------------------------
def _proj_rms_kernel(x_ref, w_ref, b_ref, g_ref, o_ref, acc_ref, *, eps,
                     out_scale):
    k = pl.program_id(1)

    @pl.when(k == 0)
    def _():
        acc_ref[...] = jnp.zeros_like(acc_ref)

    acc_ref[...] += jnp.dot(x_ref[...], w_ref[...],
                            preferred_element_type=jnp.float32)

    @pl.when(k == pl.num_programs(1) - 1)
    def _():
        y = acc_ref[...] + b_ref[...]
        ms = jnp.mean(y * y, axis=-1, keepdims=True)
        y = y * jax.lax.rsqrt(ms + eps) * g_ref[...]
        if out_scale != 1.0:
            y = y * out_scale
        o_ref[...] = y.astype(o_ref.dtype)


def project_rmsnorm(x2d, w, b, g, *, eps, out_scale=1.0, tm, tk, out_dtype):
    M, K = x2d.shape
    N = w.shape[1]
    return pl.pallas_call(
        functools.partial(_proj_rms_kernel, eps=eps, out_scale=out_scale),
        out_shape=jax.ShapeDtypeStruct((M, N), out_dtype),
        grid=(M // tm, K // tk),
        in_specs=[
            pl.BlockSpec((tm, tk), lambda i, k: (i, k)),
            pl.BlockSpec((tk, N), lambda i, k: (k, 0)),
            pl.BlockSpec((1, N), lambda i, k: (0, 0)),
            pl.BlockSpec((1, N), lambda i, k: (0, 0)),
        ],
        out_specs=pl.BlockSpec((tm, N), lambda i, k: (i, 0)),
        scratch_shapes=[pltpu.VMEM((tm, N), jnp.float32)],
        compiler_params=pltpu.CompilerParams(
            dimension_semantics=("parallel", "arbitrary"),
            vmem_limit_bytes=_VMEM_LIMIT),
    )(x2d, w, b.reshape(1, N), g.reshape(1, N))


# --------------------------------------------------------------------------
# Fused K/V projection from one context read: k = rmsnorm(c@Wk+bk)*gk,
# v = c@Wv+bv.  Each context tile is loaded once and fed to both matmuls.
# --------------------------------------------------------------------------
def _kv_proj_kernel(c_ref, wk_ref, bk_ref, gk_ref, wv_ref, bv_ref,
                    k_ref, v_ref, acck_ref, accv_ref, *, eps):
    kk = pl.program_id(1)

    @pl.when(kk == 0)
    def _():
        acck_ref[...] = jnp.zeros_like(acck_ref)
        accv_ref[...] = jnp.zeros_like(accv_ref)

    c = c_ref[...]  # one load of the context tile, two MXU matmuls
    acck_ref[...] += jnp.dot(c, wk_ref[...], preferred_element_type=jnp.float32)
    accv_ref[...] += jnp.dot(c, wv_ref[...], preferred_element_type=jnp.float32)

    @pl.when(kk == pl.num_programs(1) - 1)
    def _():
        yk = acck_ref[...] + bk_ref[...]
        ms = jnp.mean(yk * yk, axis=-1, keepdims=True)
        yk = yk * jax.lax.rsqrt(ms + eps) * gk_ref[...]
        k_ref[...] = yk.astype(k_ref.dtype)
        v_ref[...] = (accv_ref[...] + bv_ref[...]).astype(v_ref.dtype)


def project_kv(c2d, wk, bk, gk, wv, bv, *, eps, tm, tk, out_dtype):
    M, K = c2d.shape
    N = wk.shape[1]
    out_sd = jax.ShapeDtypeStruct((M, N), out_dtype)
    return pl.pallas_call(
        functools.partial(_kv_proj_kernel, eps=eps),
        out_shape=(out_sd, out_sd),
        grid=(M // tm, K // tk),
        in_specs=[
            pl.BlockSpec((tm, tk), lambda i, k: (i, k)),
            pl.BlockSpec((tk, N), lambda i, k: (k, 0)),
            pl.BlockSpec((1, N), lambda i, k: (0, 0)),
            pl.BlockSpec((1, N), lambda i, k: (0, 0)),
            pl.BlockSpec((tk, N), lambda i, k: (k, 0)),
            pl.BlockSpec((1, N), lambda i, k: (0, 0)),
        ],
        out_specs=(
            pl.BlockSpec((tm, N), lambda i, k: (i, 0)),
            pl.BlockSpec((tm, N), lambda i, k: (i, 0)),
        ),
        scratch_shapes=[pltpu.VMEM((tm, N), jnp.float32),
                        pltpu.VMEM((tm, N), jnp.float32)],
        compiler_params=pltpu.CompilerParams(
            dimension_semantics=("parallel", "arbitrary"),
            vmem_limit_bytes=_VMEM_LIMIT),
    )(c2d, wk, bk.reshape(1, N), gk.reshape(1, N), wv, bv.reshape(1, N))


# --------------------------------------------------------------------------
# Fused text+image attention, single-pass softmax.  q/k/v/o are [rows, C]
# arrays; each head is a 128-wide column block selected by the BlockSpec
# index map.  Both KV sets are small enough to live fully in VMEM as a single
# block per (batch, head), so there is no online-softmax machinery and no KV
# grid axis.  The softmax 1/sqrt(d) scale is already folded into q.
# --------------------------------------------------------------------------
def _dual_attn_kernel(q_ref, kt_ref, vt_ref, ki_ref, vi_ref, o_ref, *,
                      txt_len, txt_pad, img_len, img_pad):
    q = q_ref[...]  # (tq, d) bf16

    def one_attn(k_ref, v_ref, kv_len, kv_pad):
        s = jax.lax.dot_general(q, k_ref[...], (((1,), (1,)), ((), ())),
                                preferred_element_type=jnp.float32)
        if kv_pad != kv_len:  # mask padded key columns (static guard)
            col = jax.lax.broadcasted_iota(jnp.int32, s.shape, 1)
            s = jnp.where(col < kv_len, s, -1e30)
        m = jnp.max(s, axis=-1, keepdims=True)
        p = jnp.exp(s - m)
        l = jnp.sum(p, axis=-1, keepdims=True)
        o = jnp.dot(p.astype(v_ref.dtype), v_ref[...],
                    preferred_element_type=jnp.float32)
        return o * pl.reciprocal(l, approx=True)

    o_txt = one_attn(kt_ref, vt_ref, txt_len, txt_pad)
    o_img = one_attn(ki_ref, vi_ref, img_len, img_pad)
    o_ref[...] = (o_txt + o_img).astype(o_ref.dtype)


def dual_flash_attention(q2d, k_txt, v_txt, k_img, v_img, *, batch, lq_pad,
                         txt_pad, txt_len, img_pad, img_len, num_heads,
                         head_dim, tq, out_dtype):
    d = head_dim
    C = num_heads * d
    qb = lq_pad // tq
    return pl.pallas_call(
        functools.partial(_dual_attn_kernel, txt_len=txt_len, txt_pad=txt_pad,
                          img_len=img_len, img_pad=img_pad),
        out_shape=jax.ShapeDtypeStruct((batch * lq_pad, C), out_dtype),
        grid=(batch, num_heads, qb),
        in_specs=[
            pl.BlockSpec((tq, d), lambda b, h, qi: (b * qb + qi, h)),
            pl.BlockSpec((txt_pad, d), lambda b, h, qi: (b, h)),
            pl.BlockSpec((txt_pad, d), lambda b, h, qi: (b, h)),
            pl.BlockSpec((img_pad, d), lambda b, h, qi: (b, h)),
            pl.BlockSpec((img_pad, d), lambda b, h, qi: (b, h)),
        ],
        out_specs=pl.BlockSpec((tq, d), lambda b, h, qi: (b * qb + qi, h)),
        compiler_params=pltpu.CompilerParams(
            dimension_semantics=("parallel", "parallel", "arbitrary"),
            vmem_limit_bytes=_VMEM_LIMIT),
    )(q2d, k_txt, v_txt, k_img, v_img)


# --------------------------------------------------------------------------
# Output projection:  out = a @ Wo + bo   (the text+image add already
# happened inside the attention kernel, so only one activation input here).
# --------------------------------------------------------------------------
def _out_proj_kernel(a_ref, w_ref, b_ref, o_ref, acc_ref):
    k = pl.program_id(1)

    @pl.when(k == 0)
    def _():
        acc_ref[...] = jnp.zeros_like(acc_ref)

    acc_ref[...] += jnp.dot(a_ref[...], w_ref[...],
                            preferred_element_type=jnp.float32)

    @pl.when(k == pl.num_programs(1) - 1)
    def _():
        o_ref[...] = (acc_ref[...] + b_ref[...]).astype(o_ref.dtype)


def out_projection(a2d, w, b, *, tm, tk, out_dtype):
    M, K = a2d.shape
    N = w.shape[1]
    return pl.pallas_call(
        _out_proj_kernel,
        out_shape=jax.ShapeDtypeStruct((M, N), out_dtype),
        grid=(M // tm, K // tk),
        in_specs=[
            pl.BlockSpec((tm, tk), lambda i, k: (i, k)),
            pl.BlockSpec((tk, N), lambda i, k: (k, 0)),
            pl.BlockSpec((1, N), lambda i, k: (0, 0)),
        ],
        out_specs=pl.BlockSpec((tm, N), lambda i, k: (i, 0)),
        scratch_shapes=[pltpu.VMEM((tm, N), jnp.float32)],
        compiler_params=pltpu.CompilerParams(
            dimension_semantics=("parallel", "arbitrary"),
            vmem_limit_bytes=_VMEM_LIMIT),
    )(a2d, w, b.reshape(1, N))


# --------------------------------------------------------------------------
# WanI2VCrossAttention.forward (NAG disabled, audio_scale=None path)
# --------------------------------------------------------------------------
def wan_i2v_cross_attention(x, context, params, *, num_heads, eps=1e-6,
                            compute_dtype=jnp.bfloat16,
                            row_tile=256, k_tile=512, q_tile=256):
    B, L1, C = x.shape
    n = num_heads
    d = C // n
    assert C % n == 0
    # Heads are sliced out of the [rows, C] activations via BlockSpec column
    # blocks, so head_dim must be a multiple of 128 (true for Wan: d=128).
    assert d % 128 == 0, "head_dim must be a multiple of 128"

    cdt = compute_dtype
    f32 = jnp.float32

    context_img = context[:B, :NUM_IMG_TOKENS]  # mirrors context_img[:len(q)]
    context_txt = context[:B, NUM_IMG_TOKENS:]
    l_img = context_img.shape[1]
    l_txt = context_txt.shape[1]

    # Padding: queries to a multiple of the q tile, keys/values to a multiple
    # of 128 (padded key columns are masked inside the attention kernel,
    # padded query rows are sliced off at the end).
    l1_pad = _round_up(L1, q_tile)
    ltx_pad = _round_up(max(l_txt, 1), 128)
    lim_pad = _round_up(l_img, 128)

    # bf16 activations into the kernels (halves HBM traffic + feeds the MXU
    # its native operand width); bias / gain / accumulation stay f32.
    x2d = _pad_seq(x, l1_pad).reshape(B * l1_pad, C).astype(cdt)
    ctx_t2d = _pad_seq(context_txt, ltx_pad).reshape(B * ltx_pad, C).astype(cdt)
    ctx_i2d = _pad_seq(context_img, lim_pad).reshape(B * lim_pad, C).astype(cdt)

    def W(name):
        return params[name].astype(cdt)

    def Bv(name):
        return params[name].astype(f32)

    tk = _pick_k_tile(C, k_tile)
    tm_q = _pick_row_tile(B * l1_pad, row_tile)
    tm_t = _pick_row_tile(B * ltx_pad, row_tile)
    tm_i = _pick_row_tile(B * lim_pad, row_tile)

    # q = RMSNorm(x @ Wq + bq) * gq, with the softmax 1/sqrt(d) folded in.
    q2d = project_rmsnorm(x2d, W("wq"), Bv("bq"), Bv("gq"), eps=eps,
                          out_scale=1.0 / math.sqrt(d), tm=tm_q, tk=tk,
                          out_dtype=cdt)

    # Text-branch K/V (single pass over context_txt, RMSNorm on K only).
    k_txt, v_txt = project_kv(ctx_t2d, W("wk"), Bv("bk"), Bv("gk"),
                              W("wv"), Bv("bv"), eps=eps, tm=tm_t, tk=tk,
                              out_dtype=cdt)
    # Image-branch K/V.
    k_img, v_img = project_kv(ctx_i2d, W("wk_img"), Bv("bk_img"),
                              Bv("gk_img"), W("wv_img"), Bv("bv_img"),
                              eps=eps, tm=tm_i, tk=tk, out_dtype=cdt)

    # Fused text + image attention (one q read, one lane-dense write).
    attn = dual_flash_attention(q2d, k_txt, v_txt, k_img, v_img, batch=B,
                                lq_pad=l1_pad, txt_pad=ltx_pad, txt_len=l_txt,
                                img_pad=lim_pad, img_len=l_img, num_heads=n,
                                head_dim=d, tq=q_tile, out_dtype=cdt)

    # out = attn @ Wo + bo
    out2d = out_projection(attn, W("wo"), Bv("bo"), tm=tm_q, tk=tk,
                           out_dtype=x.dtype)
    out = out2d.reshape(B, l1_pad, C)[:, :L1]
    # TODO(synk): NAG guidance branch (offload.shared_state '_nag_*') not implemented.
    # TODO(synk): audio branch (audio_scale != None -> self.processor) not implemented.
    return out


# --------------------------------------------------------------------------
# Pure-JAX f32 reference (for correctness check)
# --------------------------------------------------------------------------
def _reference(x, context, params, num_heads, eps):
    B, L1, C = x.shape
    n, d = num_heads, C // num_heads
    context_img = context[:B, :NUM_IMG_TOKENS]
    context_txt = context[:B, NUM_IMG_TOKENS:]

    def lin(z, w, b):
        return z @ w + b

    def rms(z, g):
        zf = z.astype(jnp.float32)
        ms = jnp.mean(zf * zf, axis=-1, keepdims=True)
        return (zf * jax.lax.rsqrt(ms + eps) * g).astype(z.dtype)

    def attn(q4, k4, v4):
        s = jnp.einsum("bqnd,bknd->bnqk", q4, k4) / math.sqrt(d)
        p = jax.nn.softmax(s.astype(jnp.float32), axis=-1).astype(q4.dtype)
        o = jnp.einsum("bnqk,bknd->bqnd", p, v4)
        return o.reshape(B, L1, C)

    q = rms(lin(x, params["wq"], params["bq"]), params["gq"]).reshape(B, L1, n, d)

    k = rms(lin(context_txt, params["wk"], params["bk"]),
            params["gk"]).reshape(B, -1, n, d)
    v = lin(context_txt, params["wv"], params["bv"]).reshape(B, -1, n, d)
    x_txt = attn(q, k, v)

    k_img = rms(lin(context_img, params["wk_img"], params["bk_img"]),
                params["gk_img"]).reshape(B, -1, n, d)
    v_img = lin(context_img, params["wv_img"],
                params["bv_img"]).reshape(B, -1, n, d)
    x_img = attn(q, k_img, v_img)

    return lin(x_txt + x_img, params["wo"], params["bo"])


# --------------------------------------------------------------------------
if __name__ == "__main__":
    B, L1, C, n = 2, 256, 256, 2            # head_dim = 128
    L_txt = 255
    L2 = NUM_IMG_TOKENS + L_txt             # context = [img(257) | text(255)]
    eps = 1e-6

    key = jax.random.PRNGKey(0)
    keys = jax.random.split(key, 20)

    x = jax.random.normal(keys[0], (B, L1, C), dtype=jnp.float32)
    context = jax.random.normal(keys[1], (B, L2, C), dtype=jnp.float32)

    def w(k):
        return 0.02 * jax.random.normal(k, (C, C), dtype=jnp.float32)

    def bvec(k):
        return 0.01 * jax.random.normal(k, (C,), dtype=jnp.float32)

    def gvec(k):
        return 1.0 + 0.1 * jax.random.normal(k, (C,), dtype=jnp.float32)

    params = {
        "wq": w(keys[2]), "bq": bvec(keys[3]),
        "wk": w(keys[4]), "bk": bvec(keys[5]),
        "wv": w(keys[6]), "bv": bvec(keys[7]),
        "wo": w(keys[8]), "bo": bvec(keys[9]),
        "wk_img": w(keys[10]), "bk_img": bvec(keys[11]),
        "wv_img": w(keys[12]), "bv_img": bvec(keys[13]),
        "gq": gvec(keys[14]),
        "gk": gvec(keys[15]),
        "gk_img": gvec(keys[16]),
    }

    out = wan_i2v_cross_attention(x, context, params, num_heads=n, eps=eps)
    out = jax.block_until_ready(out)

    ref = _reference(x, context, params, n, eps)
    assert out.shape == (B, L1, C)
    max_err = float(jnp.max(jnp.abs(out - ref)))
    # bf16 MXU operands / bf16 intermediates with f32 accumulation + epilogue.
    assert jnp.allclose(out, ref, atol=2e-2, rtol=2e-2), max_err
    print("KERNEL_OK")
</pallas_src>

<mosaic_0001>
module attributes {stable_mosaic.version = 11 : i64} {
  func.func @_proj_rms_kernel(%arg0: i32, %arg1: i32, %arg2: memref<256x256xbf16, #tpu.memory_space<vmem>>, %arg3: memref<256x256xbf16, #tpu.memory_space<vmem>>, %arg4: memref<1x256xf32, #tpu.memory_space<vmem>>, %arg5: memref<1x256xf32, #tpu.memory_space<vmem>>, %arg6: memref<256x256xbf16, #tpu.memory_space<vmem>>, %arg7: memref<256x256xf32, #tpu.memory_space<vmem>>) attributes {dimension_semantics = [#tpu.dimension_semantics<parallel>, #tpu.dimension_semantics<arbitrary>], iteration_bounds = array<i64: 2, 1>, scalar_prefetch = 0 : i64, scratch_operands = 1 : i64, tpu.core_type = #tpu.core_type<tc>, window_params = [{transform_indices = @transform_0, window_bounds = array<i64: 256, 256>}, {transform_indices = @transform_1, window_bounds = array<i64: 256, 256>}, {pipeline_mode = #tpu.pipeline_mode<synchronous>, transform_indices = @transform_2, window_bounds = array<i64: 1, 256>}, {pipeline_mode = #tpu.pipeline_mode<synchronous>, transform_indices = @transform_3, window_bounds = array<i64: 1, 256>}, {transform_indices = @transform_4, window_bounds = array<i64: 256, 256>}]} {
    %c0_i32 = arith.constant 0 : i32
    %0 = arith.cmpi eq, %arg1, %c0_i32 : i32
    %1 = arith.extui %0 : i1 to i32
    %c0_i32_0 = arith.constant 0 : i32
    %2 = arith.cmpi ne, %1, %c0_i32_0 : i32
    scf.if %2 {
      %cst_10 = arith.constant 0.000000e+00 : f32
      %12 = vector.broadcast %cst_10 : f32 to vector<256x256xf32>
      %c0_11 = arith.constant 0 : index
      %c0_12 = arith.constant 0 : index
      %13 = vector.load %arg7[%c0_11, %c0_12] : memref<256x256xf32, #tpu.memory_space<vmem>>, vector<256x256xf32>
      tpu.vector_store %arg7[%c0_11, %c0_12], %12 {strides = array<i32>} : memref<256x256xf32, #tpu.memory_space<vmem>>, vector<256x256xf32>,
    } else {
    }
    %c0 = arith.constant 0 : index
    %c0_1 = arith.constant 0 : index
    %3 = vector.load %arg7[%c0, %c0_1] : memref<256x256xf32, #tpu.memory_space<vmem>>, vector<256x256xf32>
    %c0_2 = arith.constant 0 : index
    %c0_3 = arith.constant 0 : index
    %4 = vector.load %arg2[%c0_2, %c0_3] : memref<256x256xbf16, #tpu.memory_space<vmem>>, vector<256x256xbf16>
    %c0_4 = arith.constant 0 : index
    %c0_5 = arith.constant 0 : index
    %5 = vector.load %arg3[%c0_4, %c0_5] : memref<256x256xbf16, #tpu.memory_space<vmem>>, vector<256x256xbf16>
    %cst = arith.constant dense<0.000000e+00> : vector<256x256xf32>
    %6 = tpu.matmul %4, %5, %cst {dimension_numbers = #tpu.dot_dimension_numbers<[1], [0], [0], [1], [0, 0, 1, 1], [], []>} : vector<256x256xbf16>, vector<256x256xbf16>, vector<256x256xf32> -> vector<256x256xf32>
    %7 = arith.addf %3, %6 : vector<256x256xf32>
    %c0_6 = arith.constant 0 : index
    %c0_7 = arith.constant 0 : index
    %8 = vector.load %arg7[%c0_6, %c0_7] : memref<256x256xf32, #tpu.memory_space<vmem>>, vector<256x256xf32>
    tpu.vector_store %arg7[%c0_6, %c0_7], %7 {strides = array<i32>} : memref<256x256xf32, #tpu.memory_space<vmem>>, vector<256x256xf32>,
    %c0_i32_8 = arith.constant 0 : i32
    %9 = arith.cmpi eq, %arg1, %c0_i32_8 : i32
    %10 = arith.extui %9 : i1 to i32
    %c0_i32_9 = arith.constant 0 : i32
    %11 = arith.cmpi ne, %10, %c0_i32_9 : i32
    scf.if %11 {
      %c0_10 = arith.constant 0 : index
      %c0_11 = arith.constant 0 : index
      %12 = vector.load %arg7[%c0_10, %c0_11] : memref<256x256xf32, #tpu.memory_space<vmem>>, vector<256x256xf32>
      %c0_12 = arith.constant 0 : index
      %c0_13 = arith.constant 0 : index
      %13 = vector.load %arg4[%c0_12, %c0_13] : memref<1x256xf32, #tpu.memory_space<vmem>>, vector<1x256xf32>
      %14 = vector.broadcast %13 : vector<1x256xf32> to vector<256x256xf32>
      %15 = arith.addf %12, %14 : vector<256x256xf32>
      %16 = arith.mulf %15, %15 : vector<256x256xf32>
      %cst_14 = arith.constant dense<0.000000e+00> : vector<256xf32>
      %17 = vector.multi_reduction <add>, %16, %cst_14 [1] : vector<256x256xf32> to vector<256xf32>
      %18 = vector.shape_cast %17 : vector<256xf32> to vector<256x1xf32>
      %cst_15 = arith.constant 2.560000e+02 : f32
      %19 = vector.broadcast %cst_15 : f32 to vector<256x1xf32>
      %20 = arith.divf %18, %19 : vector<256x1xf32>
      %cst_16 = arith.constant 9.99999997E-7 : f32
      %21 = vector.broadcast %cst_16 : f32 to vector<256x1xf32>
      %22 = arith.addf %20, %21 : vector<256x1xf32>
      %23 = math.rsqrt %22 : vector<256x1xf32>
      %24 = vector.broadcast %23 : vector<256x1xf32> to vector<256x256xf32>
      %25 = arith.mulf %15, %24 : vector<256x256xf32>
      %c0_17 = arith.constant 0 : index
      %c0_18 = arith.constant 0 : index
      %26 = vector.load %arg5[%c0_17, %c0_18] : memref<1x256xf32, #tpu.memory_space<vmem>>, vector<1x256xf32>
      %27 = vector.broadcast %26 : vector<1x256xf32> to vector<256x256xf32>
      %28 = arith.mulf %25, %27 : vector<256x256xf32>
      %cst_19 = arith.constant 0.0883883461 : f32
      %29 = vector.broadcast %cst_19 : f32 to vector<256x256xf32>
      %30 = arith.mulf %28, %29 : vector<256x256xf32>
      %31 = arith.truncf %30 : vector<256x256xf32> to vector<256x256xbf16>
      %c0_20 = arith.constant 0 : index
      %c0_21 = arith.constant 0 : index
      %32 = vector.load %arg6[%c0_20, %c0_21] : memref<256x256xbf16, #tpu.memory_space<vmem>>, vector<256x256xbf16>
      tpu.vector_store %arg6[%c0_20, %c0_21], %31 {strides = array<i32>} : memref<256x256xbf16, #tpu.memory_space<vmem>>, vector<256x256xbf16>,
    } else {
    }
    return
  }
  func.func @transform_0(%arg0: i32, %arg1: i32) -> (i32, i32) {
    %c0_i32 = arith.constant 0 : i32
    return %arg0, %arg1 : i32, i32
  }
  func.func @transform_1(%arg0: i32, %arg1: i32) -> (i32, i32) {
    %c0_i32 = arith.constant 0 : i32
    %c0_i32_0 = arith.constant 0 : i32
    return %arg1, %c0_i32 : i32, i32
  }
  func.func @transform_2(%arg0: i32, %arg1: i32) -> (i32, i32) {
    %c0_i32 = arith.constant 0 : i32
    %c0_i32_0 = arith.constant 0 : i32
    %c0_i32_1 = arith.constant 0 : i32
    return %c0_i32, %c0_i32_0 : i32, i32
  }
  func.func @transform_3(%arg0: i32, %arg1: i32) -> (i32, i32) {
    %c0_i32 = arith.constant 0 : i32
    %c0_i32_0 = arith.constant 0 : i32
    %c0_i32_1 = arith.constant 0 : i32
    return %c0_i32, %c0_i32_0 : i32, i32
  }
  func.func @transform_4(%arg0: i32, %arg1: i32) -> (i32, i32) {
    %c0_i32 = arith.constant 0 : i32
    %c0_i32_0 = arith.constant 0 : i32
    return %arg0, %c0_i32 : i32, i32
  }
}

</mosaic_0001>

<bundles_post_ra>
// kernel: tpu_custom_call.1
= control target key start
LH: loop header
LB: loop body
LE: loop exit
PB: predicated region body
PF: predicated region fallthrough
CT: control target
= control target key end

     0   :  { %9 = vsyncpa [#allocation4], 0  ;;  %s3601_s0 = inlined_call_operand.hbm [shape: bf16[512,256], index: 0, kind: input, shape index: {}]   ;;  %s3602_s1 = inlined_call_operand.hbm [shape: bf16[256,256], index: 1, kind: input, shape index: {}]   ;;  %s3603_s2 = inlined_call_operand.hbm [shape: f32[1,256], index: 2, kind: input, shape index: {}]   ;;  %s3604_s3 = inlined_call_operand.hbm [shape: f32[1,256], index: 3, kind: input, shape index: {}]   ;;  %s3605_s4 = inlined_call_operand.hbm [shape: bf16[512,256], index: 4, kind: output, shape index: {}]  }
   0x1   :  { %11 = vsyncpa [#allocation4 + $0x1], 0 }
   0x2   :  { %12 = vsyncpa [#allocation7], 0 }
   0x3   :  { %13 = vsyncpa [#allocation10], 0 }
   0x4   :  { %14 = vsyncpa [#allocation5], 0 }
   0x5   :  { %16 = vsyncpa [#allocation5 + $0x1], 0  ;;  %s2765_s15 = smov 0   ;;  %s2767_s16 = smov 0  }
   0x6   :  { %s2769_s17 = smov 0   ;;  %s2771_s18 = smov 0  }
   0x7   :  { %s2773_s19 = smov 0   ;;  %s2775_s20 = smov 0  }
   0x8 LB: > { %s2081_s21 = sadd.s32 4294967295, %s2729_s20   ;;  %s2082_s22 = sadd.s32 4294967294, %s2729_s20   ;;  %s2729_s20 = sphi %s2775_s20, %s22_s20   ;;  %s2725_s19 = sphi %s2773_s19, %s3696_s19   ;;  %s2721_s18 = sphi %s2771_s18, %s3695_s18   ;;  %s2717_s17 = sphi %s2769_s17, %s3694_s17   ;;  %s2713_s16 = sphi %s2767_s16, %s3693_s16   ;;  %s2709_s15 = sphi %s2765_s15, %s3692_s15  }
   0x9   : > { %p56_p0 = scmp.ne.s32.totalorder %s2713_s16, %s2709_s15  ;;  %p2799_p1 = scmp.eq.s32.totalorder %s2081_s21, 0 }
   0xa   : > { %p2803_p2 = scmp.eq.s32.totalorder %s2081_s21, 1  ;;  %p154_p3 = scmp.eq.s32.totalorder %s2082_s22, 1 }
   0xb   : > { %s3633_s23 = scalar_select %p2799_p1, 1, 0 }
   0xc   : > { %s3634_s24 = scalar_select %p2803_p2, 1, 0 }
   0xd   : > { %p2809_p4 = por %p2799_p1, %p56_p0  ;;  %p2083_p5 = scmp.ge.s32.totalorder %s2729_s20, 1 }
   0xe   : > { %p2814_p6 = por %p154_p3, %p56_p0  ;;  %p161_p7 = scmp.lt.s32.totalorder %s2729_s20, 3 }
   0xf   : > { %s3635_s25 = scalar_select %p2809_p4, 1, 0 }
  0x10   : > { %s3636_s26 = scalar_select %p2814_p6, 1, 0 }
  0x11   : > { %p2819_p8 = pnand %p2083_p5, %p161_p7  ;;  %s2731_s28 = smov [#allocation6]  }
  0x12   : > { %3637 = sst [smem:[#allocation16_spill]] %s3636_s26  ;;  %s177_s29 = sshll.u32 %s2731_s28, 4  ;;  %s2823_s29 = int_to_ptr.vmem [resolvable:$true] %s177_s29 }
  0x13   : > { %s3638_s27 = scalar_select %p2819_p8, 1, 0 }
  0x14   : > { %p2284_p9 = pneg %p2819_p8  ;;  %s2732_s5 = smov [#allocation8]  }
  0x15   : > { %s191_s6 = sshll.u32 %s2732_s5, 4  ;;  %s2733_s7 = smov [#allocation9]   ;;  %s2834_s6 = int_to_ptr.vmem [resolvable:$true] %s191_s6 }
  0x16   : > { %p2830_p11 = pnand %p2284_p9, %p2799_p1  ;;  %s2836_s8 = sshll.u32 %s2733_s7, 4  ;;  %s203_s8 = int_to_ptr.vmem [resolvable:$true] %s2836_s8 }
  0x17   : > { %s2525_s11 = scalar_lea.hbm %s3602_s1, 4096 }
  0x18   : > { %p2526_p12 = scmp.ne.s32.totalorder %s3602_s1, %s2525_s11  ;;  %p2846_p13 = pneg %p2830_p11 }
  0x19   : > { %p2532_p5 = scmp.lt.u32.totalorder %s2525_s11, %s3602_s1 }
  0x1a   : > { %p2528_p0 = pnand %p2846_p13, %p2526_p12 }
  0x1c   : > { %p2529_p3 = pneg %p2528_p0 }
  0x1e   : > { %p2534_p7 = pnand %p2532_p5, %p2529_p3 }
  0x20   : > { %2537 = shalt.err (!%p2534_p7)
}
  0x21   : > { %s2538_s28 = scalar_lea.vmem %s2823_s29, 4096  ;;  %p2546_p1 = scmp.lt.s32.totalorder %s2823_s29, %s2823_s29 }
  0x22   : > { %p2539_p9 = scmp.ne.s32.totalorder %s2823_s29, %s2538_s28  ;;  %p2547_p4 = scmp.lt.s32.totalorder %s2538_s28, %s2538_s28 }
  0x24   : > { %p2541_p10 = pnand %p2539_p9, %p2846_p13  ;;  %p2548_p12 = por %p2547_p4, %p2546_p1 }
  0x26   : > { %p2542_p6 = pneg %p2541_p10 }
  0x28   : > { %p2549_p0 = pnand %p2548_p12, %p2542_p6 }
  0x2a   : > { %2552 = shalt.err (!%p2549_p0)
}
  0x2b   : > { %s2734_s5 = smov 128   ;;  %s2735_s7 = smov 8  }
  0x2c   : > { %2287 = dma.hbm_to_vmem [thread:$0]  (!%p2830_p11), %s3602_s1, 4096, %s2823_s29, [#allocation7], %s2734_s5, %s2734_s5, %s2735_s7  }
  0x2d   : > { %s2553_s13 = scalar_lea.hbm %s3603_s2, 32 }
  0x2e   : > { %p2554_p1 = scmp.ne.s32.totalorder %s3603_s2, %s2553_s13  ;;  %p2560_p10 = scmp.lt.u32.totalorder %s2553_s13, %s3603_s2 }
  0x30   : > { %p2556_p4 = pnand %p2554_p1, %p2846_p13 }
  0x32   : > { %p2557_p6 = pneg %p2556_p4 }
  0x34   : > { %p2562_p3 = pnand %p2560_p10, %p2557_p6 }
  0x36   : > { %2565 = shalt.err (!%p2562_p3)
}
  0x37   : > { %s2566_s29 = scalar_lea.vmem %s2834_s6, 32  ;;  %p2574_p12 = scmp.lt.s32.totalorder %s2834_s6, %s2834_s6 }
  0x38   : > { %p2567_p5 = scmp.ne.s32.totalorder %s2834_s6, %s2566_s29  ;;  %p2575_p0 = scmp.lt.s32.totalorder %s2566_s29, %s2566_s29 }
  0x3a   : > { %p2569_p7 = pnand %p2567_p5, %p2846_p13  ;;  %p2576_p1 = por %p2575_p0, %p2574_p12 }
  0x3c   : > { %p2570_p9 = pneg %p2569_p7 }
  0x3e   : > { %p2577_p4 = pnand %p2576_p1, %p2570_p9 }
  0x40   : > { %2580 = shalt.err (!%p2577_p4)
}
  0x41   : > { %2290 = dma.hbm_to_vmem [thread:$0]  (!%p2830_p11), %s3603_s2, 32, %s2834_s6, [#allocation7]  }
  0x42   : > { %s2581_s12 = scalar_lea.hbm %s3604_s3, 32 }
  0x43   : > { %p2582_p6 = scmp.ne.s32.totalorder %s3604_s3, %s2581_s12  ;;  %p2588_p5 = scmp.lt.u32.totalorder %s2581_s12, %s3604_s3 }
  0x45   : > { %p2584_p10 = pnand %p2582_p6, %p2846_p13 }
  0x47   : > { %p2585_p3 = pneg %p2584_p10 }
  0x49   : > { %p2590_p7 = pnand %p2588_p5, %p2585_p3 }
  0x4b   : > { %2593 = shalt.err (!%p2590_p7)
}
  0x4c   : > { %s2594_s29 = scalar_lea.vmem %s203_s8, 32  ;;  %p2602_p1 = scmp.lt.s32.totalorder %s203_s8, %s203_s8 }
  0x4d   : > { %p2595_p9 = scmp.ne.s32.totalorder %s203_s8, %s2594_s29  ;;  %p2603_p4 = scmp.lt.s32.totalorder %s2594_s29, %s2594_s29 }
  0x4f   : > { %p2597_p12 = pnand %p2595_p9, %p2846_p13  ;;  %p2604_p8 = por %p2603_p4, %p2602_p1 }
  0x51   : > { %p2598_p0 = pneg %p2597_p12 }
  0x53   : > { %p2605_p2 = pnand %p2604_p8, %p2598_p0 }
  0x55   : > { %2608 = shalt.err (!%p2605_p2)
}
  0x56   : > { %2293 = dma.hbm_to_vmem [thread:$0]  (!%p2830_p11), %s3604_s3, 32, %s203_s8, [#allocation10]  }
  0x57   : > { %s43_s14 = sadd.s32 1, %s2717_s17  ;;  %s34_s9 = sadd.s32 1, %s2725_s19 }
  0x58   : > { %p50_p2 = scmp.ne.s32.totalorder %s2717_s17, %s2713_s16  ;;  %p36_p8 = scmp.ge.s32.totalorder %s34_s9, 2 }
  0x59   : > { %p51_p13 = scmp.eq.s32.totalorder %s2729_s20, 0  ;;  %p3641_p6 = scmp.ne.s32.totalorder %s3634_s24, 0 }
  0x5a   : > { %p2305_p3 = scmp.lt.s32.totalorder %s2729_s20, 2  ;;  %s3698_s9 = smov (%p36_p8, %s34_s9), 0 }
  0x5b   : > { %p2919_p10 = por %p3641_p6, %p50_p2  ;;  %p52_p5 = por %p51_p13, %p50_p2 }
  0x5c   : > { %s213_s10 = sand.u32 1, %s2717_s17   ;;  %s38_s11 = ssub.s32 %s2725_s19, %s3698_s9 }
  0x5d   : > { %p41_p7 = scmp.eq.s32.totalorder %s38_s11, 0  ;;  %s2088_s8 = sshll.u32 %s213_s10, 8 }
  0x5e   : > { %s2201_s12 = sshll.u32 %s2725_s19, 12  ;;  %s217_s28 = scalar_lea.vmem [#allocation3], %s2088_s8 }
  0x5f   : > { %s2931_s13 = scalar_select %p41_p7, %s2717_s17, %s43_s14  }
  0x60   : > { %s2936_s24 = scalar_lea.hbm %s3601_s0, %s2201_s12  ;;  %s227_s29 = sshll.u32 %s217_s28, 4  ;;  %s2938_s29 = int_to_ptr.vmem [resolvable:$true] %s227_s29 }
  0x61   : > { %p2942_p11 = pnand %p2305_p3, %p52_p5  ;;  %s2946_s26 = scalar_lea.sflag [#allocation4], %s213_s10 }
  0x62   : > { %s2609_s14 = scalar_lea.hbm %s2936_s24, 4096  ;;  %s2614_s12 = scalar_lea.hbm %s3601_s0, 8192 }
  0x63   : > { %p2610_p9 = scmp.ne.s32.totalorder %s2936_s24, %s2609_s14  ;;  %p2611_p12 = pneg %p2942_p11 }
  0x64   : > { %p2615_p4 = scmp.lt.u32.totalorder %s2936_s24, %s3601_s0  ;;  %p2616_p2 = scmp.lt.u32.totalorder %s2614_s12, %s2609_s14 }
  0x65   : > { %p2612_p0 = pnand %p2611_p12, %p2610_p9  ;;  %p2618_p13 = scmp.lt.u32.totalorder %s2609_s14, %s2936_s24 }
  0x66   : > { %p2617_p8 = por %p2616_p2, %p2615_p4 }
  0x67   : > { %p2613_p1 = pneg %p2612_p0 }
  0x68   : > { %p2619_p6 = por %p2618_p13, %p2617_p8 }
  0x6a   : > { %p2620_p3 = pnand %p2619_p6, %p2613_p1 }
  0x6c   : > { %2623 = shalt.err (!%p2620_p3)
}
  0x6d   : > { %s2624_s10 = scalar_lea.vmem %s2938_s29, 4096  ;;  %s2736_s28 = smov [#allocation3]  }
  0x6e   : > { %p2625_p5 = scmp.ne.s32.totalorder %s2938_s29, %s2624_s10  ;;  %s2629_s11 = sshll.u32 %s2736_s28, 4  ;;  %s2630_s11 = int_to_ptr.vmem [resolvable:$false] %s2629_s11 }
  0x6f   : > { %s2631_s8 = scalar_lea.vmem %s2630_s11, 8192  ;;  %p2632_p0 = scmp.lt.s32.totalorder %s2938_s29, %s2630_s11 }
  0x70   : > { %p2627_p7 = pnand %p2625_p5, %p2611_p12  ;;  %p2633_p4 = scmp.lt.s32.totalorder %s2631_s8, %s2624_s10 }
  0x72   : > { %p2628_p9 = pneg %p2627_p7  ;;  %p2634_p2 = por %p2633_p4, %p2632_p0 }
  0x74   : > { %p2635_p8 = pnand %p2634_p2, %p2628_p9 }
  0x76   : > { %2638 = shalt.err (!%p2635_p8)
}
  0x77   : > { %2297 = dma.hbm_to_vmem [thread:$0]  (!%p2942_p11), %s2936_s24, 4096, %s2938_s29, %s2946_s26, %s2734_s5, %s2734_s5, %s2735_s7  }
  0x78   : > { %p3644_p12 = scmp.ne.s32.totalorder %s3638_s27, 0 }
  0x7a   : > { %239 = sbr.rel (%p3644_p12) target bundleno = 681 (0x2a9), region = 36 }
  0x81   : > { %s2980_s14 = sand.u32 1, %s2713_s16   ;;  %p3645_p1 = scmp.ne.s32.totalorder %s3635_s25, 0 }
  0x82   : > { %s2093_s12 = sshll.u32 %s2980_s14, 8  ;;  %s242_s21 = scalar_lea.sflag [#allocation4], %s2980_s14 }
  0x83   : > { %s2986_s6 = scalar_lea.vmem [#allocation3], %s2093_s12 }
  0x84   : > { %2692 = dma.done.wait (%p3645_p1), %s242_s21, 4096  }
  0x85   : > { %2694 = vsyncadd (%p3645_p1), %s242_s21, 4294963200  ;;  %p3646_p11 = scmp.ne.s32.totalorder %s3633_s23, 0 }
  0x87   : > { %2696 = dma.done.wait (%p3646_p11), [#allocation7], 4128  }
  0x88   : > { %2698 = vsyncadd (%p3646_p11), [#allocation7], 4294963168 }
  0x89   : > { %2700 = dma.done.wait (%p3646_p11), [#allocation10], 32  }
  0x8a   : > { %2702 = vsyncadd (%p3646_p11), [#allocation10], 4294967264  ;;  %v2365_v0 = vld [vmem:[#allocation6 + $0x4] ss:$8 sps:$4 sm:$0xff]   ;;  %v2367_v1 = vld [vmem:[#allocation6] ss:$8 sps:$4 sm:$0xff]  }
  0x8b   : > { %802 = vmatprep.subr.bf16.mxu0 %v2365_v0  ;;  %2236 = vmatprep.subr.bf16.mxu1 %v2365_v0  ;;  %v2368_v2 = vld [vmem:[#allocation6 + $0x14] ss:$8 sps:$4 sm:$0xff]   ;;  %v2370_v3 = vld [vmem:[#allocation6 + $0x10] ss:$8 sps:$4 sm:$0xff]   ;;  %v2371_v4 = vld [vmem:[#allocation6 + $0x24] ss:$8 sps:$4 sm:$0xff]   ;;  %v1192_v0 = vlaneseq }
  0x8c   : > { %803 = vmatpush1.bf16.msra.mxu0 %v2367_v1  ;;  %2252 = vmatpush1.bf16.msra.mxu1 %v2367_v1  ;;  %v2373_v5 = vld [vmem:[#allocation6 + $0x20] ss:$8 sps:$4 sm:$0xff]   ;;  %v2374_v6 = vld [vmem:[#allocation6 + $0x34] ss:$8 sps:$4 sm:$0xff]   ;;  %v2376_v7 = vld [vmem:[#allocation6 + $0x30] ss:$8 sps:$4 sm:$0xff]  }
  0x8d   : > { %804 = vmatprep.subr.bf16.mxu0 %v2368_v2  ;;  %2237 = vmatprep.subr.bf16.mxu1 %v2368_v2  ;;  %v2377_v8 = vld [vmem:[#allocation6 + $0x44] ss:$8 sps:$4 sm:$0xff]   ;;  %v2379_v9 = vld [vmem:[#allocation6 + $0x40] ss:$8 sps:$4 sm:$0xff]   ;;  %v2380_v10 = vld [vmem:[#allocation6 + $0x54] ss:$8 sps:$4 sm:$0xff]  }
  0x8e   : > { %v2382_v11 = vld [vmem:[#allocation6 + $0x50] ss:$8 sps:$4 sm:$0xff]   ;;  %v2383_v12 = vld [vmem:[#allocation6 + $0x64] ss:$8 sps:$4 sm:$0xff]   ;;  %v2385_v14 = vld [vmem:[#allocation6 + $0x60] ss:$8 sps:$4 sm:$0xff]  }
  0x8f   : > { %v2415_v13 = vld [vmem:[%s2986_s6 + $0x4] ss:$8 sps:$4 sm:$0xff]   ;;  %v2386_v16 = vld [vmem:[#allocation6 + $0x74] ss:$8 sps:$4 sm:$0xff]   ;;  %v2388_v17 = vld [vmem:[#allocation6 + $0x70] ss:$8 sps:$4 sm:$0xff]  }
  0x90   : > { %805 = vmatpush1.bf16.msra.mxu0 %v2370_v3  ;;  %2253 = vmatpush1.bf16.msra.mxu1 %v2370_v3  ;;  %v2418_v15 = vld [vmem:[%s2986_s6 + $0x84] ss:$8 sps:$4 sm:$0xff]   ;;  %v2391_v19 = vld [vmem:[#allocation6 + $0x80] ss:$8 sps:$4 sm:$0xff]   ;;  %v2392_v20 = vld [vmem:[#allocation6 + $0x94] ss:$8 sps:$4 sm:$0xff]  }
  0x91   : > { %806 = vmatprep.subr.bf16.mxu0 %v2371_v4  ;;  %2238 = vmatprep.subr.bf16.mxu1 %v2371_v4  ;;  %v2389_v18 = vld [vmem:[#allocation6 + $0x84] ss:$8 sps:$4 sm:$0xff]   ;;  %v2394_v21 = vld [vmem:[#allocation6 + $0x90] ss:$8 sps:$4 sm:$0xff]   ;;  %v2397_v23 = vld [vmem:[#allocation6 + $0xa0] ss:$8 sps:$4 sm:$0xff]  }
  0x92   : > { %834 = vmatprep.mubr.bf16.mxu0 %v2415_v13  ;;  %914 = vmatprep.mubr.bf16.mxu1 %v2418_v15  ;;  %v2395_v22 = vld [vmem:[#allocation6 + $0xa4] ss:$8 sps:$4 sm:$0xff]   ;;  %v2398_v24 = vld [vmem:[#allocation6 + $0xb4] ss:$8 sps:$4 sm:$0xff]   ;;  %v2400_v25 = vld [vmem:[#allocation6 + $0xb0] ss:$8 sps:$4 sm:$0xff]  }
  0x93   : > { %v2401_v26 = vld [vmem:[#allocation6 + $0xc4] ss:$8 sps:$4 sm:$0xff]   ;;  %v2403_v27 = vld [vmem:[#allocation6 + $0xc0] ss:$8 sps:$4 sm:$0xff]   ;;  %v2404_v28 = vld [vmem:[#allocation6 + $0xd4] ss:$8 sps:$4 sm:$0xff]  }
  0x94   : > { %807 = vmatpush1.bf16.msra.mxu0 %v2373_v5  ;;  %2254 = vmatpush1.bf16.msra.mxu1 %v2373_v5  ;;  %v2406_v29 = vld [vmem:[#allocation6 + $0xd0] ss:$8 sps:$4 sm:$0xff]   ;;  %v2407_v30 = vld [vmem:[#allocation6 + $0xe4] ss:$8 sps:$4 sm:$0xff]   ;;  %v2409_v31 = vld [vmem:[#allocation6 + $0xe0] ss:$8 sps:$4 sm:$0xff]  }
  0x95   : > { %808 = vmatprep.subr.bf16.mxu0 %v2374_v6  ;;  %2239 = vmatprep.subr.bf16.mxu1 %v2374_v6  ;;  %v2410_v32 = vld [vmem:[#allocation6 + $0xf4] ss:$8 sps:$4 sm:$0xff]   ;;  %v2412_v33 = vld [vmem:[#allocation6 + $0xf0] ss:$8 sps:$4 sm:$0xff]   ;;  %v2413_v34 = vld [vmem:[%s2986_s6] ss:$8 sps:$4 sm:$0xff]  }
  0x96   : > { %v2416_v35 = vld [vmem:[%s2986_s6 + $0x80] ss:$8 sps:$4 sm:$0xff]   ;;  %v2419_v36 = vld [vmem:[%s2986_s6 + $0x14] ss:$8 sps:$4 sm:$0xff]   ;;  %v2421_v38 = vld [vmem:[%s2986_s6 + $0x10] ss:$8 sps:$4 sm:$0xff]  }
  0x97   : > { %v2422_v37 = vld [vmem:[%s2986_s6 + $0x94] ss:$8 sps:$4 sm:$0xff]   ;;  %v2424_v39 = vld [vmem:[%s2986_s6 + $0x90] ss:$8 sps:$4 sm:$0xff]   ;;  %v2425_v40 = vld [vmem:[%s2986_s6 + $0x24] ss:$8 sps:$4 sm:$0xff]  }
  0x98   : > { %809 = vmatpush1.bf16.msra.mxu0 %v2376_v7  ;;  %2255 = vmatpush1.bf16.msra.mxu1 %v2376_v7  ;;  %v2428_v41 = vld [vmem:[%s2986_s6 + $0xa4] ss:$8 sps:$4 sm:$0xff]   ;;  %v2427_v42 = vld [vmem:[%s2986_s6 + $0x20] ss:$8 sps:$4 sm:$0xff]   ;;  %v2431_v44 = vld [vmem:[%s2986_s6 + $0x34] ss:$8 sps:$4 sm:$0xff]  }
  0x99   : > { %810 = vmatprep.subr.bf16.mxu0 %v2377_v8  ;;  %2240 = vmatprep.subr.bf16.mxu1 %v2377_v8  ;;  %v2430_v43 = vld [vmem:[%s2986_s6 + $0xa0] ss:$8 sps:$4 sm:$0xff]   ;;  %v2434_v45 = vld [vmem:[%s2986_s6 + $0xb4] ss:$8 sps:$4 sm:$0xff]   ;;  %v2433_v46 = vld [vmem:[%s2986_s6 + $0x30] ss:$8 sps:$4 sm:$0xff]  }
  0x9a   : > { %v2436_v47 = vld [vmem:[%s2986_s6 + $0xb0] ss:$8 sps:$4 sm:$0xff]   ;;  %v2437_v48 = vld [vmem:[%s2986_s6 + $0x44] ss:$8 sps:$4 sm:$0xff]   ;;  %v2439_v50 = vld [vmem:[%s2986_s6 + $0x40] ss:$8 sps:$4 sm:$0xff]  }
  0x9b   : > { %v2440_v49 = vld [vmem:[%s2986_s6 + $0xc4] ss:$8 sps:$4 sm:$0xff]   ;;  %v2442_v51 = vld [vmem:[%s2986_s6 + $0xc0] ss:$8 sps:$4 sm:$0xff]   ;;  %v2443_v52 = vld [vmem:[%s2986_s6 + $0x54] ss:$8 sps:$4 sm:$0xff]  }
  0x9c   : > { %811 = vmatpush1.bf16.msra.mxu0 %v2379_v9  ;;  %2256 = vmatpush1.bf16.msra.mxu1 %v2379_v9  ;;  %v2446_v53 = vld [vmem:[%s2986_s6 + $0xd4] ss:$8 sps:$4 sm:$0xff]   ;;  %v2445_v54 = vld [vmem:[%s2986_s6 + $0x50] ss:$8 sps:$4 sm:$0xff]   ;;  %v2449_v56 = vld [vmem:[%s2986_s6 + $0x64] ss:$8 sps:$4 sm:$0xff]  }
  0x9d   : > { %812 = vmatprep.subr.bf16.mxu0 %v2380_v10  ;;  %2241 = vmatprep.subr.bf16.mxu1 %v2380_v10  ;;  %v2448_v55 = vld [vmem:[%s2986_s6 + $0xd0] ss:$8 sps:$4 sm:$0xff]   ;;  %v2452_v57 = vld [vmem:[%s2986_s6 + $0xe4] ss:$8 sps:$4 sm:$0xff]   ;;  %v2451_v58 = vld [vmem:[%s2986_s6 + $0x60] ss:$8 sps:$4 sm:$0xff]  }
  0x9e   : > { %v2454_v59 = vld [vmem:[%s2986_s6 + $0xe0] ss:$8 sps:$4 sm:$0xff]   ;;  %v2455_v60 = vld [vmem:[%s2986_s6 + $0x74] ss:$8 sps:$4 sm:$0xff]   ;;  %v2457_v62 = vld [vmem:[%s2986_s6 + $0x70] ss:$8 sps:$4 sm:$0xff]  }
  0x9f   : > { %v2458_v61 = vld [vmem:[%s2986_s6 + $0xf4] ss:$8 sps:$4 sm:$0xff]   ;;  %v2460_v63 = vld [vmem:[%s2986_s6 + $0xf0] ss:$8 sps:$4 sm:$0xff]   ;;  %v3032_v1 = vshrl.u32 %v1192_v0, 7  ;;  %s3386_s23 = scalar_lea.vmem [#allocation11], %s2093_s12 }
  0xa0   : > { %813 = vmatpush1.bf16.msra.mxu0 %v2382_v11  ;;  %2257 = vmatpush1.bf16.msra.mxu1 %v2382_v11  ;;  %v1190_v3 = vld [vmem:[#allocation8] sm:$0x3]  ;;  %s2235_s25 = sshll.u32 %s2721_s18, 12  ;;  %s1966_s27 = sshll.u32 %s3386_s23, 4  ;;  %s3550_s27 = int_to_ptr.vmem [resolvable:$true] %s1966_s27 }
  0xa1   : > { %814 = vmatprep.subr.bf16.mxu0 %v2383_v12  ;;  %2242 = vmatprep.subr.bf16.mxu1 %v2383_v12  ;;  %v3612_v2 = vsub.s32 0, %v3032_v1  ;;  %v3611_v4 = vsub.s32 1, %v3032_v1  ;;  %s3548_s24 = scalar_lea.hbm %s3605_s4, %s2235_s25  ;;  %s1952_s18 = scalar_lea.sflag [#allocation5], %s2980_s14 }
  0xa2   : > { %s2639_s29 = scalar_lea.vmem %s3550_s27, 4096  ;;  %s2737_s26 = smov [#allocation11]  }
  0xa3   : > { %v3038_v5 = vrot.slane %v1190_v3, %v3612_v2  ;;  %v3042_v6 = vrot.slane %v1190_v3, %v3611_v4  ;;  %p2640_p13 = scmp.ne.s32.totalorder %s3550_s27, %s2639_s29  ;;  %s2643_s22 = sshll.u32 %s2737_s26, 4  ;;  %s2644_s22 = int_to_ptr.vmem [resolvable:$false] %s2643_s22 }
  0xa4   : > { %815 = vmatpush1.bf16.msra.mxu0 %v2385_v14  ;;  %2258 = vmatpush1.bf16.msra.mxu1 %v2385_v14  ;;  %s2645_s10 = scalar_lea.vmem %s2644_s22, 8192  ;;  %p2646_p5 = scmp.lt.s32.totalorder %s3550_s27, %s2644_s22 }
  0xa5   : > { %816 = vmatprep.subr.bf16.mxu0 %v2386_v16  ;;  %2243 = vmatprep.subr.bf16.mxu1 %v2386_v16  ;;  %p2641_p6 = pnand %p2640_p13, %p2919_p10  ;;  %p2647_p7 = scmp.lt.s32.totalorder %s2645_s10, %s2639_s29 }
  0xa7   : > { %p2642_p3 = pneg %p2641_p6  ;;  %p2648_p9 = por %p2647_p7, %p2646_p5 }
  0xa8   : > { %817 = vmatpush1.bf16.msra.mxu0 %v2388_v17  ;;  %2259 = vmatpush1.bf16.msra.mxu1 %v2388_v17 }
  0xa9   : > { %818 = vmatprep.subr.bf16.mxu0 %v2389_v18  ;;  %2244 = vmatprep.subr.bf16.mxu1 %v2389_v18  ;;  %p2649_p0 = pnand %p2648_p9, %p2642_p3 }
  0xac   : > { %819 = vmatpush1.bf16.msra.mxu0 %v2391_v19  ;;  %2260 = vmatpush1.bf16.msra.mxu1 %v2391_v19 }
  0xad   : > { %820 = vmatprep.subr.bf16.mxu0 %v2392_v20  ;;  %2245 = vmatprep.subr.bf16.mxu1 %v2392_v20 }
  0xb0   : > { %821 = vmatpush1.bf16.msra.mxu0 %v2394_v21  ;;  %2261 = vmatpush1.bf16.msra.mxu1 %v2394_v21 }
  0xb1   : > { %822 = vmatprep.subr.bf16.mxu0 %v2395_v22  ;;  %2246 = vmatprep.subr.bf16.mxu1 %v2395_v22 }
  0xb4   : > { %823 = vmatpush1.bf16.msra.mxu0 %v2397_v23  ;;  %2262 = vmatpush1.bf16.msra.mxu1 %v2397_v23 }
  0xb5   : > { %824 = vmatprep.subr.bf16.mxu0 %v2398_v24  ;;  %2247 = vmatprep.subr.bf16.mxu1 %v2398_v24 }
  0xb8   : > { %825 = vmatpush1.bf16.msra.mxu0 %v2400_v25  ;;  %2263 = vmatpush1.bf16.msra.mxu1 %v2400_v25 }
  0xb9   : > { %826 = vmatprep.subr.bf16.mxu0 %v2401_v26  ;;  %2248 = vmatprep.subr.bf16.mxu1 %v2401_v26 }
  0xbc   : > { %827 = vmatpush1.bf16.msra.mxu0 %v2403_v27  ;;  %2264 = vmatpush1.bf16.msra.mxu1 %v2403_v27 }
  0xbd   : > { %828 = vmatprep.subr.bf16.mxu0 %v2404_v28  ;;  %2249 = vmatprep.subr.bf16.mxu1 %v2404_v28 }
  0xc0   : > { %829 = vmatpush1.bf16.msra.mxu0 %v2406_v29  ;;  %2265 = vmatpush1.bf16.msra.mxu1 %v2406_v29 }
  0xc1   : > { %830 = vmatprep.subr.bf16.mxu0 %v2407_v30  ;;  %2250 = vmatprep.subr.bf16.mxu1 %v2407_v30 }
  0xc4   : > { %831 = vmatpush1.bf16.msra.mxu0 %v2409_v31  ;;  %2266 = vmatpush1.bf16.msra.mxu1 %v2409_v31 }
  0xc5   : > { %832 = vmatprep.subr.bf16.mxu0 %v2410_v32  ;;  %2251 = vmatprep.subr.bf16.mxu1 %v2410_v32 }
  0xc8   : > { %833 = vmatpush1.bf16.msra.mxu0 %v2412_v33  ;;  %2267 = vmatpush1.bf16.msra.mxu1 %v2412_v33 }
  0xcb   : > { %835 = vmatmul.mubr.bf16.vlgmr.msra.gmra.mrb[0].mxu0 %v2413_v34  ;;  %915 = vmatmul.mubr.bf16.vlgmr.msra.gmra.mrb[0].mxu1 %v2416_v35 }
  0xcc   : > { %844 = vmatprep.mubr.bf16.mxu0 %v2419_v36  ;;  %924 = vmatprep.mubr.bf16.mxu1 %v2422_v37 }
  0xd3   : > { %845 = vmatmul.mubr.bf16.gmra.mrb[4].mxu0 %v2421_v38  ;;  %925 = vmatmul.mubr.bf16.gmra.mrb[4].mxu1 %v2424_v39 }
  0xd4   : > { %854 = vmatprep.mubr.bf16.mxu0 %v2425_v40  ;;  %934 = vmatprep.mubr.bf16.mxu1 %v2428_v41 }
  0xdb   : > { %855 = vmatmul.mubr.bf16.gmra.mrb[8].mxu0 %v2427_v42  ;;  %935 = vmatmul.mubr.bf16.gmra.mrb[8].mxu1 %v2430_v43 }
  0xdc   : > { %864 = vmatprep.mubr.bf16.mxu0 %v2431_v44  ;;  %944 = vmatprep.mubr.bf16.mxu1 %v2434_v45 }
  0xe3   : > { %865 = vmatmul.mubr.bf16.gmra.mrb[12].mxu0 %v2433_v46  ;;  %945 = vmatmul.mubr.bf16.gmra.mrb[12].mxu1 %v2436_v47 }
  0xe4   : > { %874 = vmatprep.mubr.bf16.mxu0 %v2437_v48  ;;  %954 = vmatprep.mubr.bf16.mxu1 %v2440_v49 }
  0xeb   : > { %875 = vmatmul.mubr.bf16.gmra.mrb[16].mxu0 %v2439_v50  ;;  %955 = vmatmul.mubr.bf16.gmra.mrb[16].mxu1 %v2442_v51 }
  0xec   : > { %884 = vmatprep.mubr.bf16.mxu0 %v2443_v52  ;;  %964 = vmatprep.mubr.bf16.mxu1 %v2446_v53 }
  0xf3   : > { %885 = vmatmul.mubr.bf16.gmra.mrb[20].mxu0 %v2445_v54  ;;  %965 = vmatmul.mubr.bf16.gmra.mrb[20].mxu1 %v2448_v55 }
  0xf4   : > { %894 = vmatprep.mubr.bf16.mxu0 %v2449_v56  ;;  %974 = vmatprep.mubr.bf16.mxu1 %v2452_v57 }
  0xfb   : > { %895 = vmatmul.mubr.bf16.gmra.mrb[24].mxu0 %v2451_v58  ;;  %975 = vmatmul.mubr.bf16.gmra.mrb[24].mxu1 %v2454_v59 }
  0xfc   : > { %904 = vmatprep.mubr.bf16.mxu0 %v2455_v60  ;;  %984 = vmatprep.mubr.bf16.mxu1 %v2458_v61 }
 0x103   : > { %905 = vmatmul.mubr.bf16.gmra.mrb[28].mxu0 %v2457_v62  ;;  %985 = vmatmul.mubr.bf16.gmra.mrb[28].mxu1 %v2460_v63 }
 0x19e   : > { %v836_v7 = vpop.f32.mrb[0].mxu0  ;;  %v916_v8 = vpop.f32.mrb[0].mxu1 }
 0x19f   : > { %v3045_v9 = vadd.f32 %v3038_v5, %v836_v7  ;;  %v3048_v10 = vadd.f32 %v3038_v5, %v916_v8  ;;  %v838_v11 = vpop.f32.mrb[1].mxu0  ;;  %v918_v12 = vpop.f32.mrb[1].mxu1 }
 0x1a0   : > { %v3051_v13 = vadd.f32 %v3042_v6, %v838_v11  ;;  %v3054_v14 = vadd.f32 %v3042_v6, %v918_v12  ;;  %v840_v15 = vpop.f32.mrb[2].mxu0  ;;  %v920_v16 = vpop.f32.mrb[2].mxu1 }
 0x1a1   : > { %v3057_v17 = vadd.f32 %v3038_v5, %v920_v16  ;;  %v842_v18 = vpop.f32.mrb[3].mxu0  ;;  %v922_v19 = vpop.f32.mrb[3].mxu1  ;;  %v1266_v20 = vmul.f32 %v3045_v9, %v3045_v9  ;;  %v1298_v23 = vmul.f32 %v3048_v10, %v3048_v10  ;;  %v3069_v24 = vadd.f32 %v3038_v5, %v840_v15 }
 0x1a2   : > { %v3062_v21 = vadd.f32 %v3042_v6, %v922_v19  ;;  %v1267_v22 = vmul.f32 %v3051_v13, %v3051_v13  ;;  %v1299_v26 = vmul.f32 %v3054_v14, %v3054_v14  ;;  %v3076_v27 = vadd.f32 %v3042_v6, %v842_v18 }
 0x1a3   : > { %v1300_v25 = vmul.f32 %v3057_v17, %v3057_v17  ;;  %v1268_v33 = vmul.f32 %v3069_v24, %v3069_v24 }
 0x1a4   : > { %v1330_v28 = vadd.f32 %v1267_v22, %v1266_v20  ;;  %v1301_v29 = vmul.f32 %v3062_v21, %v3062_v21  ;;  %v1269_v38 = vmul.f32 %v3076_v27, %v3076_v27  ;;  %v1378_v42 = vadd.f32 %v1299_v26, %v1298_v23 }
 0x1a6   : > { %1331 = vadd.xlane.f32.xlu0 %v1330_v28  ;;  %v846_v30 = vpop.f32.mrb[4].mxu0  ;;  %v1381_v31 = vadd.f32 %v1301_v29, %v1300_v25  ;;  %v926_v32 = vpop.f32.mrb[4].mxu1  ;;  %v1333_v56 = vadd.f32 %v1269_v38, %v1268_v33 }
 0x1a7   : > { %v3083_v34 = vadd.f32 %v3038_v5, %v846_v30  ;;  %v848_v35 = vpop.f32.mrb[5].mxu0  ;;  %v3086_v36 = vadd.f32 %v3038_v5, %v926_v32  ;;  %v928_v37 = vpop.f32.mrb[5].mxu1 }
 0x1a8   : > { %v3091_v39 = vadd.f32 %v3042_v6, %v848_v35  ;;  %1382 = vadd.xlane.f32.xlu1 %v1381_v31  ;;  %v850_v40 = vpop.f32.mrb[6].mxu0  ;;  %v3094_v41 = vadd.f32 %v3042_v6, %v928_v37  ;;  %v930_v43 = vpop.f32.mrb[6].mxu1 }
 0x1a9   : > { %v1270_v44 = vmul.f32 %v3083_v34, %v3083_v34  ;;  %v3099_v45 = vadd.f32 %v3038_v5, %v850_v40  ;;  %v852_v46 = vpop.f32.mrb[7].mxu0  ;;  %v932_v47 = vpop.f32.mrb[7].mxu1  ;;  %v1302_v50 = vmul.f32 %v3086_v36, %v3086_v36  ;;  %v3111_v52 = vadd.f32 %v3038_v5, %v930_v43 }
 0x1aa   : > { %v1271_v48 = vmul.f32 %v3091_v39, %v3091_v39  ;;  %v3104_v49 = vadd.f32 %v3042_v6, %v852_v46  ;;  %v1303_v51 = vmul.f32 %v3094_v41, %v3094_v41  ;;  %1379 = vadd.xlane.f32.xlu0 %v1378_v42  ;;  %v3114_v53 = vadd.f32 %v3042_v6, %v932_v47 }
 0x1ab   : > { %v1272_v54 = vmul.f32 %v3099_v45, %v3099_v45  ;;  %v1304_v61 = vmul.f32 %v3111_v52, %v3111_v52 }
 0x1ac   : > { %v1273_v55 = vmul.f32 %v3104_v49, %v3104_v49  ;;  %v1336_v57 = vadd.f32 %v1271_v48, %v1270_v44  ;;  %v1384_v60 = vadd.f32 %v1303_v51, %v1302_v50  ;;  %v1305_v62 = vmul.f32 %v3114_v53, %v3114_v53 }
 0x1ae   : > { %1334 = vadd.xlane.f32.xlu0 %v1333_v56  ;;  %1337 = vadd.xlane.f32.xlu1 %v1336_v57  ;;  %v856_v58 = vpop.f32.mrb[8].mxu0  ;;  %v936_v59 = vpop.f32.mrb[8].mxu1  ;;  %v1339_v15 = vadd.f32 %v1273_v55, %v1272_v54  ;;  %v1387_v30 = vadd.f32 %v1305_v62, %v1304_v61 }
 0x1af   : > { %v3125_v63 = vadd.f32 %v3038_v5, %v856_v58  ;;  %v858_v0 = vpop.f32.mrb[9].mxu0  ;;  %v3128_v3 = vadd.f32 %v3038_v5, %v936_v59  ;;  %v938_v7 = vpop.f32.mrb[9].mxu1 }
 0x1b0   : > { %v3131_v8 = vadd.f32 %v3042_v6, %v858_v0  ;;  %v860_v11 = vpop.f32.mrb[10].mxu0  ;;  %v3134_v12 = vadd.f32 %v3042_v6, %v938_v7  ;;  %v940_v16 = vpop.f32.mrb[10].mxu1 }
 0x1b1   : > { %v1274_v18 = vmul.f32 %v3125_v63, %v3125_v63  ;;  %v3139_v19 = vadd.f32 %v3038_v5, %v860_v11  ;;  %v862_v20 = vpop.f32.mrb[11].mxu0  ;;  %v1306_v22 = vmul.f32 %v3128_v3, %v3128_v3  ;;  %v942_v23 = vpop.f32.mrb[11].mxu1  ;;  %v3151_v29 = vadd.f32 %v3038_v5, %v940_v16 }
 0x1b2   : > { %v1275_v25 = vmul.f32 %v3131_v8, %v3131_v8  ;;  %v3146_v26 = vadd.f32 %v3042_v6, %v862_v20  ;;  %v1307_v28 = vmul.f32 %v3134_v12, %v3134_v12  ;;  %1385 = vadd.xlane.f32.xlu0 %v1384_v60  ;;  %1340 = vadd.xlane.f32.xlu1 %v1339_v15 }
 0x1b3   : > { %v1276_v31 = vmul.f32 %v3139_v19, %v3139_v19  ;;  %v3158_v33 = vadd.f32 %v3042_v6, %v942_v23  ;;  %v1308_v42 = vmul.f32 %v3151_v29, %v3151_v29 }
 0x1b4   : > { %v1277_v32 = vmul.f32 %v3146_v26, %v3146_v26  ;;  %v1342_v35 = vadd.f32 %v1275_v25, %v1274_v18  ;;  %v1390_v40 = vadd.f32 %v1307_v28, %v1306_v22 }
 0x1b5   : > { %v1309_v48 = vmul.f32 %v3158_v33, %v3158_v33 }
 0x1b6   : > { %1388 = vadd.xlane.f32.xlu1 %v1387_v30  ;;  %1343 = vadd.xlane.f32.xlu0 %v1342_v35  ;;  %v866_v37 = vpop.f32.mrb[12].mxu0  ;;  %v946_v38 = vpop.f32.mrb[12].mxu1  ;;  %v1345_v55 = vadd.f32 %v1277_v32, %v1276_v31 }
 0x1b7   : > { %v3163_v43 = vadd.f32 %v3038_v5, %v866_v37  ;;  %v868_v44 = vpop.f32.mrb[13].mxu0  ;;  %v3166_v46 = vadd.f32 %v3038_v5, %v946_v38  ;;  %v948_v47 = vpop.f32.mrb[13].mxu1  ;;  %v1393_v20 = vadd.f32 %v1309_v48, %v1308_v42 }
 0x1b8   : > { %v3171_v50 = vadd.f32 %v3042_v6, %v868_v44  ;;  %v870_v51 = vpop.f32.mrb[14].mxu0  ;;  %v3174_v54 = vadd.f32 %v3042_v6, %v948_v47  ;;  %v950_v56 = vpop.f32.mrb[14].mxu1 }
 0x1b9   : > { %v1278_v57 = vmul.f32 %v3163_v43, %v3163_v43  ;;  %v3179_v58 = vadd.f32 %v3038_v5, %v870_v51  ;;  %v872_v59 = vpop.f32.mrb[15].mxu0  ;;  %v1310_v60 = vmul.f32 %v3166_v46, %v3166_v46  ;;  %v952_v61 = vpop.f32.mrb[15].mxu1  ;;  %v3191_v11 = vadd.f32 %v3038_v5, %v950_v56 }
 0x1ba   : > { %v1279_v62 = vmul.f32 %v3171_v50, %v3171_v50  ;;  %v3186_v0 = vadd.f32 %v3042_v6, %v872_v59  ;;  %v1311_v7 = vmul.f32 %v3174_v54, %v3174_v54  ;;  %1391 = vadd.xlane.f32.xlu0 %v1390_v40  ;;  %1346 = vadd.xlane.f32.xlu1 %v1345_v55 }
 0x1bb   : > { %v3194_v15 = vadd.f32 %v3042_v6, %v952_v61  ;;  %v1280_v16 = vmul.f32 %v3179_v58, %v3179_v58  ;;  %v1312_v30 = vmul.f32 %v3191_v11, %v3191_v11 }
 0x1bc   : > { %v1281_v18 = vmul.f32 %v3186_v0, %v3186_v0  ;;  %v1348_v22 = vadd.f32 %v1279_v62, %v1278_v57  ;;  %v1396_v28 = vadd.f32 %v1311_v7, %v1310_v60 }
 0x1bd   : > { %v1313_v31 = vmul.f32 %v3194_v15, %v3194_v15 }
 0x1be   : > { %1394 = vadd.xlane.f32.xlu1 %v1393_v20  ;;  %1349 = vadd.xlane.f32.xlu0 %v1348_v22  ;;  %v876_v23 = vpop.f32.mrb[16].mxu0  ;;  %v956_v25 = vpop.f32.mrb[16].mxu1  ;;  %v1351_v47 = vadd.f32 %v1281_v18, %v1280_v16 }
 0x1bf   : > { %v3205_v32 = vadd.f32 %v3038_v5, %v876_v23  ;;  %v878_v35 = vpop.f32.mrb[17].mxu0  ;;  %v3208_v37 = vadd.f32 %v3038_v5, %v956_v25  ;;  %v958_v38 = vpop.f32.mrb[17].mxu1  ;;  %v1399_v16 = vadd.f32 %v1313_v31, %v1312_v30 }
 0x1c0   : > { %v3211_v40 = vadd.f32 %v3042_v6, %v878_v35  ;;  %v880_v42 = vpop.f32.mrb[18].mxu0  ;;  %v3214_v44 = vadd.f32 %v3042_v6, %v958_v38  ;;  %v960_v48 = vpop.f32.mrb[18].mxu1 }
 0x1c1   : > { %v1282_v51 = vmul.f32 %v3205_v32, %v3205_v32  ;;  %v3219_v55 = vadd.f32 %v3038_v5, %v880_v42  ;;  %v882_v56 = vpop.f32.mrb[19].mxu0  ;;  %v1314_v57 = vmul.f32 %v3208_v37, %v3208_v37  ;;  %v962_v59 = vpop.f32.mrb[19].mxu1  ;;  %v3231_v7 = vadd.f32 %v3038_v5, %v960_v48 }
 0x1c2   : > { %v1283_v60 = vmul.f32 %v3211_v40, %v3211_v40  ;;  %v3226_v61 = vadd.f32 %v3042_v6, %v882_v56  ;;  %v1315_v62 = vmul.f32 %v3214_v44, %v3214_v44  ;;  %1397 = vadd.xlane.f32.xlu0 %v1396_v28  ;;  %1352 = vadd.xlane.f32.xlu1 %v1351_v47 }
 0x1c3   : > { %v1284_v18 = vmul.f32 %v3219_v55, %v3219_v55  ;;  %v3238_v22 = vadd.f32 %v3042_v6, %v962_v59  ;;  %v1316_v38 = vmul.f32 %v3231_v7, %v3231_v7 }
 0x1c4   : > { %v1285_v20 = vmul.f32 %v3226_v61, %v3226_v61  ;;  %v1354_v23 = vadd.f32 %v1283_v60, %v1282_v51  ;;  %v1402_v28 = vadd.f32 %v1315_v62, %v1314_v57 }
 0x1c5   : > { %v1317_v48 = vmul.f32 %v3238_v22, %v3238_v22 }
 0x1c6   : > { %1400 = vadd.xlane.f32.xlu1 %v1399_v16  ;;  %1355 = vadd.xlane.f32.xlu0 %v1354_v23  ;;  %v886_v25 = vpop.f32.mrb[20].mxu0  ;;  %v966_v35 = vpop.f32.mrb[20].mxu1  ;;  %v1357_v59 = vadd.f32 %v1285_v20, %v1284_v18 }
 0x1c7   : > { %v3243_v30 = vadd.f32 %v3038_v5, %v886_v25  ;;  %v888_v31 = vpop.f32.mrb[21].mxu0  ;;  %v3246_v42 = vadd.f32 %v3038_v5, %v966_v35  ;;  %v968_v47 = vpop.f32.mrb[21].mxu1 }
 0x1c8   : > { %v3251_v51 = vadd.f32 %v3042_v6, %v888_v31  ;;  %v890_v56 = vpop.f32.mrb[22].mxu0  ;;  %v3254_v57 = vadd.f32 %v3042_v6, %v968_v47  ;;  %v970_v60 = vpop.f32.mrb[22].mxu1 }
 0x1c9   : > { %3647 = vst [vmem:[#allocation17_spill] sm:$0xff] %v3243_v30  ;;  %3648 = vst [vmem:[#allocation18_spill] sm:$0xff] %v3246_v42  ;;  %v1286_v62 = vmul.f32 %v3243_v30, %v3243_v30  ;;  %v3259_v16 = vadd.f32 %v3038_v5, %v890_v56  ;;  %v892_v23 = vpop.f32.mrb[23].mxu0  ;;  %v1318_v25 = vmul.f32 %v3246_v42, %v3246_v42  ;;  %v972_v35 = vpop.f32.mrb[23].mxu1 }
 0x1ca   : > { %3649 = vst [vmem:[#allocation19_spill] sm:$0xff] %v3251_v51  ;;  %3650 = vst [vmem:[#allocation20_spill] sm:$0xff] %v3254_v57  ;;  %v1287_v31 = vmul.f32 %v3251_v51, %v3251_v51  ;;  %v3266_v4 = vadd.f32 %v3042_v6, %v892_v23  ;;  %v1319_v18 = vmul.f32 %v3254_v57, %v3254_v57  ;;  %1403 = vadd.xlane.f32.xlu0 %v1402_v28 }
 0x1cb   : > { %3651 = vst [vmem:[#allocation21_spill] sm:$0xff] %v3259_v16  ;;  %1358 = vadd.xlane.f32.xlu1 %v1357_v59  ;;  %v3271_v20 = vadd.f32 %v3038_v5, %v970_v60  ;;  %v3274_v47 = vadd.f32 %v3042_v6, %v972_v35  ;;  %v1288_v56 = vmul.f32 %v3259_v16, %v3259_v16 }
 0x1cc   : > { %v1289_v2 = vmul.f32 %v3266_v4, %v3266_v4  ;;  %v1405_v42 = vadd.f32 %v1317_v48, %v1316_v38  ;;  %v1360_v23 = vadd.f32 %v1287_v31, %v1286_v62  ;;  %v1408_v28 = vadd.f32 %v1319_v18, %v1318_v25 }
 0x1cd   : > { %3652 = vst [vmem:[#allocation22_spill] sm:$0xff] %v3271_v20  ;;  %3653 = vst [vmem:[#allocation23_spill] sm:$0xff] %v3274_v47  ;;  %v1320_v59 = vmul.f32 %v3271_v20, %v3271_v20  ;;  %v1321_v60 = vmul.f32 %v3274_v47, %v3274_v47 }
 0x1ce   : > { %1361 = vadd.xlane.f32.xlu0 %v1360_v23  ;;  %v896_v51 = vpop.f32.mrb[24].mxu0  ;;  %v976_v57 = vpop.f32.mrb[24].mxu1  ;;  %v1363_v25 = vadd.f32 %v1289_v2, %v1288_v56 }
 0x1cf   : > { %1406 = vadd.xlane.f32.xlu1 %v1405_v42  ;;  %v3285_v35 = vadd.f32 %v3038_v5, %v896_v51  ;;  %v898_v16 = vpop.f32.mrb[25].mxu0  ;;  %v3288_v30 = vadd.f32 %v3038_v5, %v976_v57  ;;  %v978_v38 = vpop.f32.mrb[25].mxu1 }
 0x1d0   : > { %v3291_v42 = vadd.f32 %v3042_v6, %v898_v16  ;;  %v900_v48 = vpop.f32.mrb[26].mxu0  ;;  %v3294_v62 = vadd.f32 %v3042_v6, %v978_v38  ;;  %v980_v31 = vpop.f32.mrb[26].mxu1  ;;  %v1411_v38 = vadd.f32 %v1321_v60, %v1320_v59 }
 0x1d1   : > { %3654 = vst [vmem:[#allocation24_spill] sm:$0xff] %v3285_v35  ;;  %3655 = vst [vmem:[#allocation25_spill] sm:$0xff] %v3288_v30  ;;  %v1290_v18 = vmul.f32 %v3285_v35, %v3285_v35  ;;  %v3299_v51 = vadd.f32 %v3038_v5, %v900_v48  ;;  %v902_v23 = vpop.f32.mrb[27].mxu0  ;;  %v1322_v57 = vmul.f32 %v3288_v30, %v3288_v30  ;;  %v982_v47 = vpop.f32.mrb[27].mxu1 }
 0x1d2   : > { %3656 = vst [vmem:[#allocation26_spill] sm:$0xff] %v3291_v42  ;;  %3657 = vst [vmem:[#allocation27_spill] sm:$0xff] %v3294_v62  ;;  %v1291_v16 = vmul.f32 %v3291_v42, %v3291_v42  ;;  %v3306_v20 = vadd.f32 %v3042_v6, %v902_v23  ;;  %v1323_v2 = vmul.f32 %v3294_v62, %v3294_v62  ;;  %1409 = vadd.xlane.f32.xlu0 %v1408_v28 }
 0x1d3   : > { %1364 = vadd.xlane.f32.xlu1 %v1363_v25  ;;  %v3311_v56 = vadd.f32 %v3038_v5, %v980_v31  ;;  %v1292_v48 = vmul.f32 %v3299_v51, %v3299_v51  ;;  %v3318_v42 = vadd.f32 %v3042_v6, %v982_v47 }
 0x1d4   : > { %3658 = vst [vmem:[#allocation28_spill] sm:$0xff] %v3306_v20  ;;  %v1293_v30 = vmul.f32 %v3306_v20, %v3306_v20  ;;  %v1366_v23 = vadd.f32 %v1291_v16, %v1290_v18  ;;  %v1414_v28 = vadd.f32 %v1323_v2, %v1322_v57 }
 0x1d5   : > { %3659 = vst [vmem:[#allocation29_spill] sm:$0xff] %v3311_v56  ;;  %3660 = vst [vmem:[#allocation30_spill] sm:$0xff] %v3318_v42  ;;  %v1324_v25 = vmul.f32 %v3311_v56, %v3311_v56  ;;  %v1325_v47 = vmul.f32 %v3318_v42, %v3318_v42 }
 0x1d6   : > { %1367 = vadd.xlane.f32.xlu0 %v1366_v23  ;;  %v906_v35 = vpop.f32.mrb[28].mxu0  ;;  %v986_v62 = vpop.f32.mrb[28].mxu1  ;;  %v1369_v2 = vadd.f32 %v1293_v30, %v1292_v48 }
 0x1d7   : > { %1412 = vadd.xlane.f32.xlu1 %v1411_v38  ;;  %v3323_v59 = vadd.f32 %v3038_v5, %v906_v35  ;;  %v908_v60 = vpop.f32.mrb[29].mxu0  ;;  %v3326_v31 = vadd.f32 %v3038_v5, %v986_v62  ;;  %v988_v20 = vpop.f32.mrb[29].mxu1 }
 0x1d8   : > { %v3331_v18 = vadd.f32 %v3042_v6, %v908_v60  ;;  %v910_v16 = vpop.f32.mrb[30].mxu0  ;;  %v3334_v57 = vadd.f32 %v3042_v6, %v988_v20  ;;  %v990_v38 = vpop.f32.mrb[30].mxu1 }
 0x1d9   : > { %3661 = vst [vmem:[#allocation31_spill] sm:$0xff] %v3323_v59  ;;  %3662 = vst [vmem:[#allocation32_spill] sm:$0xff] %v3326_v31  ;;  %v1294_v35 = vmul.f32 %v3323_v59, %v3323_v59  ;;  %v3339_v23 = vadd.f32 %v3038_v5, %v910_v16  ;;  %v912_v62 = vpop.f32.mrb[31].mxu0  ;;  %v1326_v56 = vmul.f32 %v3326_v31, %v3326_v31  ;;  %v992_v60 = vpop.f32.mrb[31].mxu1 }
 0x1da   : > { %3663 = vst [vmem:[#allocation33_spill] sm:$0xff] %v3331_v18  ;;  %3664 = vst [vmem:[#allocation34_spill] sm:$0xff] %v3334_v57  ;;  %v3344_v42 = vadd.f32 %v3038_v5, %v990_v38  ;;  %v1295_v20 = vmul.f32 %v3331_v18, %v3331_v18  ;;  %v3349_v30 = vadd.f32 %v3042_v6, %v912_v62  ;;  %1415 = vadd.xlane.f32.xlu0 %v1414_v28 }
 0x1db   : > { %3665 = vst [vmem:[#allocation35_spill] sm:$0xff] %v3339_v23  ;;  %v1327_v48 = vmul.f32 %v3334_v57, %v3334_v57  ;;  %1370 = vadd.xlane.f32.xlu1 %v1369_v2  ;;  %v3354_v16 = vadd.f32 %v3042_v6, %v992_v60  ;;  %v1296_v31 = vmul.f32 %v3339_v23, %v3339_v23 }
 0x1dc   : > { %3666 = vst [vmem:[#allocation36_spill] sm:$0xff] %v3349_v30  ;;  %v1297_v5 = vmul.f32 %v3349_v30, %v3349_v30  ;;  %v1417_v38 = vadd.f32 %v1325_v47, %v1324_v25  ;;  %v1372_v59 = vadd.f32 %v1295_v20, %v1294_v35  ;;  %v1328_v18 = vmul.f32 %v3344_v42, %v3344_v42 }
 0x1dd   : > { %v1420_v62 = vadd.f32 %v1327_v48, %v1326_v56  ;;  %v1329_v28 = vmul.f32 %v3354_v16, %v3354_v16 }
 0x1de   : > { %1373 = vadd.xlane.f32.xlu0 %v1372_v59  ;;  %v1375_v2 = vadd.f32 %v1297_v5, %v1296_v31  ;;  %v1587_v5 = vld [vmem:[#allocation9] sm:$0x3] }
 0x1df   : > { %1418 = vadd.xlane.f32.xlu1 %v1417_v38  ;;  %v1423_v6 = vadd.f32 %v1329_v28, %v1328_v18 }
 0x1e2   : > { %1421 = vadd.xlane.f32.xlu0 %v1420_v62 }
 0x1e3   : > { %1376 = vadd.xlane.f32.xlu1 %v1375_v2 }
 0x1e7   : > { %1424 = vadd.xlane.f32.xlu1 %v1423_v6 }
 0x233   : > { %v1332_v60 = vpop.xlane.xlu0 %1331 }
 0x234   : > { %v1427_v23 = vmul.f32 0.00390625, %v1332_v60  ;;  %v3668_v60 = vsub.s32 1, %v3032_v1 }
 0x235   : > { %v1383_v57 = vpop.xlane.xlu1 %1382 }
 0x236   : > { %v1459_v30 = vadd.f32 1e-06, %v1427_v23  ;;  %v1444_v25 = vmul.f32 0.00390625, %v1383_v57  ;;  %v3667_v57 = vsub.s32 0, %v3032_v1 }
 0x237   : > { %v1380_v47 = vpop.xlane.xlu0 %1379 }
 0x238   : > { %2461 = vrsqrt.f32 %v1459_v30  ;;  %v1476_v59 = vadd.f32 1e-06, %v1444_v25  ;;  %v1443_v56 = vmul.f32 0.00390625, %v1380_v47  ;;  %v3366_v30 = vrot.slane %v1587_v5, %v3667_v57 }
 0x239   : > { %v3370_v25 = vrot.slane %v1587_v5, %v3668_v60 }
 0x23a   : > { %2463 = vrsqrt.f32 %v1476_v59  ;;  %v1475_v35 = vadd.f32 1e-06, %v1443_v56 }
 0x23b   : > { %v1335_v20 = vpop.xlane.xlu0 %1334  ;;  %v1338_v48 = vpop.xlane.xlu1 %1337 }
 0x23c   : > { %2465 = vrsqrt.f32 %v1475_v35  ;;  %v1428_v38 = vmul.f32 0.00390625, %v1335_v20  ;;  %v1429_v31 = vmul.f32 0.00390625, %v1338_v48 }
 0x23e   : > { %v1460_v62 = vadd.f32 1e-06, %v1428_v38  ;;  %v1461_v18 = vadd.f32 1e-06, %v1429_v31 }
 0x23f   : > { %v1386_v28 = vpop.xlane.xlu0 %1385  ;;  %v1341_v2 = vpop.xlane.xlu1 %1340 }
 0x240   : > { %2467 = vrsqrt.f32 %v1460_v62  ;;  %v1445_v6 = vmul.f32 0.00390625, %v1386_v28  ;;  %v1430_v23 = vmul.f32 0.00390625, %v1341_v2 }
 0x241   : > { %2469 = vrsqrt.f32 %v1461_v18 }
 0x242   : > { %v2462_v47 = vpop.eup %2461  ;;  %v1477_v59 = vadd.f32 1e-06, %v1445_v6  ;;  %v1462_v56 = vadd.f32 1e-06, %v1430_v23 }
 0x243   : > { %v1523_v35 = vmul.f32 %v2462_v47, %v3045_v9  ;;  %v1524_v20 = vmul.f32 %v2462_v47, %v3051_v13  ;;  %v1389_v48 = vpop.xlane.xlu1 %1388  ;;  %v1344_v38 = vpop.xlane.xlu0 %1343 }
 0x244   : > { %v2464_v31 = vpop.eup %2463  ;;  %2471 = vrsqrt.f32 %v1477_v59  ;;  %v1446_v62 = vmul.f32 0.00390625, %v1389_v48  ;;  %v1431_v28 = vmul.f32 0.00390625, %v1344_v38 }
 0x245   : > { %v1599_v2 = vmul.f32 %v3366_v30, %v1523_v35  ;;  %v1600_v1 = vmul.f32 %v3370_v25, %v1524_v20  ;;  %v1557_v5 = vmul.f32 %v2464_v31, %v3057_v17  ;;  %v1558_v18 = vmul.f32 %v2464_v31, %v3062_v21 }
 0x246   : > { %v2466_v6 = vpop.eup %2465  ;;  %2473 = vrsqrt.f32 %v1462_v56  ;;  %v1478_v23 = vadd.f32 1e-06, %v1446_v62  ;;  %v1463_v9 = vadd.f32 1e-06, %v1431_v28 }
 0x247   : > { %v1663_v57 = vmul.f32 0.088388346, %v1599_v2  ;;  %v1664_v13 = vmul.f32 0.088388346, %v1600_v1  ;;  %v1633_v60 = vmul.f32 %v3366_v30, %v1557_v5  ;;  %v1634_v47 = vmul.f32 %v3370_v25, %v1558_v18  ;;  %v1392_v59 = vpop.xlane.xlu0 %1391  ;;  %v1347_v48 = vpop.xlane.xlu1 %1346 }
 0x248   : > { %v1555_v35 = vmul.f32 %v2466_v6, %v3048_v10  ;;  %v1556_v20 = vmul.f32 %v2466_v6, %v3054_v14  ;;  %2475 = vrsqrt.f32 %v1478_v23  ;;  %v1447_v17 = vmul.f32 0.00390625, %v1392_v59 }
 0x249   : > { %v2202_v21 = vpack.c.bf16 %v1664_v13, %v1663_v57  ;;  %v1697_v38 = vmul.f32 0.088388346, %v1633_v60  ;;  %v1698_v56 = vmul.f32 0.088388346, %v1634_v47  ;;  %2477 = vrsqrt.f32 %v1463_v9 }
 0x24a   : > { %v2468_v31 = vpop.eup %2467  ;;  %v1631_v62 = vmul.f32 %v3366_v30, %v1555_v35  ;;  %v1632_v28 = vmul.f32 %v3370_v25, %v1556_v20  ;;  %v1479_v2 = vadd.f32 1e-06, %v1447_v17  ;;  %v1432_v1 = vmul.f32 0.00390625, %v1347_v48 }
 0x24b   : > { %v2470_v5 = vpop.eup %2469  ;;  %1919 = vst [vmem:[%s3386_s23] sm:$0xff] %v2202_v21  ;;  %v2219_v10 = vpack.c.bf16 %v1698_v56, %v1697_v38  ;;  %v1525_v14 = vmul.f32 %v2468_v31, %v3069_v24  ;;  %v1526_v18 = vmul.f32 %v2468_v31, %v3076_v27  ;;  %v1395_v6 = vpop.xlane.xlu1 %1394 }
 0x24c   : > { %v1350_v23 = vpop.xlane.xlu0 %1349  ;;  %v1695_v9 = vmul.f32 0.088388346, %v1631_v62  ;;  %v1696_v57 = vmul.f32 0.088388346, %v1632_v28  ;;  %v1527_v13 = vmul.f32 %v2470_v5, %v3083_v34  ;;  %v1528_v60 = vmul.f32 %v2470_v5, %v3091_v39 }
 0x24d   : > { %1936 = vst [vmem:[%s3386_s23 + $0x88] sm:$0xff] %v2219_v10  ;;  %v1601_v47 = vmul.f32 %v3366_v30, %v1525_v14  ;;  %v1602_v59 = vmul.f32 %v3370_v25, %v1526_v18  ;;  %2479 = vrsqrt.f32 %v1479_v2  ;;  %v1464_v48 = vadd.f32 1e-06, %v1432_v1 }
 0x24e   : > { %v2472_v35 = vpop.eup %2471  ;;  %v2218_v24 = vpack.c.bf16 %v1696_v57, %v1695_v9  ;;  %v1603_v27 = vmul.f32 %v3366_v30, %v1527_v13  ;;  %v1604_v20 = vmul.f32 %v3370_v25, %v1528_v60  ;;  %v1448_v17 = vmul.f32 0.00390625, %v1395_v6 }
 0x24f   : > { %v1665_v21 = vmul.f32 0.088388346, %v1601_v47  ;;  %v1666_v38 = vmul.f32 0.088388346, %v1602_v59  ;;  %v1559_v34 = vmul.f32 %v2472_v35, %v3086_v36  ;;  %v1560_v39 = vmul.f32 %v2472_v35, %v3094_v41  ;;  %v1353_v31 = vpop.xlane.xlu1 %1352 }
 0x250   : > { %v1398_v56 = vpop.xlane.xlu0 %1397  ;;  %v2474_v62 = vpop.eup %2473  ;;  %1935 = vst [vmem:[%s3386_s23 + $0x80] sm:$0xff] %v2218_v24  ;;  %v1667_v28 = vmul.f32 0.088388346, %v1603_v27  ;;  %v1668_v2 = vmul.f32 0.088388346, %v1604_v20  ;;  %2481 = vrsqrt.f32 %v1464_v48  ;;  %v1433_v9 = vmul.f32 0.00390625, %v1350_v23 }
 0x251   : > { %v1480_v1 = vadd.f32 1e-06, %v1448_v17  ;;  %v2203_v5 = vpack.c.bf16 %v1666_v38, %v1665_v21  ;;  %v1635_v10 = vmul.f32 %v3366_v30, %v1559_v34  ;;  %v1636_v14 = vmul.f32 %v3370_v25, %v1560_v39 }
 0x252   : > { %v1529_v18 = vmul.f32 %v2474_v62, %v3099_v45  ;;  %v2476_v36 = vpop.eup %2475  ;;  %v2204_v6 = vpack.c.bf16 %v1668_v2, %v1667_v28  ;;  %v1530_v41 = vmul.f32 %v2474_v62, %v3104_v49  ;;  %v1465_v21 = vadd.f32 1e-06, %v1433_v9 }
 0x253   : > { %2483 = vrsqrt.f32 %v1480_v1  ;;  %v2478_v57 = vpop.eup %2477  ;;  %1920 = vst [vmem:[%s3386_s23 + $0x8] sm:$0xff] %v2203_v5  ;;  %v1699_v13 = vmul.f32 0.088388346, %v1635_v10  ;;  %v1700_v60 = vmul.f32 0.088388346, %v1636_v14  ;;  %v1561_v59 = vmul.f32 %v2476_v36, %v3111_v52  ;;  %v1401_v48 = vpop.xlane.xlu1 %1400 }
 0x254   : > { %v1605_v47 = vmul.f32 %v3366_v30, %v1529_v18  ;;  %v1356_v35 = vpop.xlane.xlu0 %1355  ;;  %1921 = vst [vmem:[%s3386_s23 + $0x10] sm:$0xff] %v2204_v6  ;;  %v1606_v45 = vmul.f32 %v3370_v25, %v1530_v41  ;;  %v1562_v24 = vmul.f32 %v2476_v36, %v3114_v53  ;;  %v1531_v49 = vmul.f32 %v2478_v57, %v3125_v63 }
 0x255   : > { %v1532_v23 = vmul.f32 %v2478_v57, %v3131_v8  ;;  %v2220_v27 = vpack.c.bf16 %v1700_v60, %v1699_v13  ;;  %v1637_v17 = vmul.f32 %v3366_v30, %v1561_v59  ;;  %2485 = vrsqrt.f32 %v1465_v21 }
 0x256   : > { %v1669_v20 = vmul.f32 0.088388346, %v1605_v47  ;;  %v1670_v38 = vmul.f32 0.088388346, %v1606_v45  ;;  %v1638_v52 = vmul.f32 %v3370_v25, %v1562_v24  ;;  %v1607_v34 = vmul.f32 %v3366_v30, %v1531_v49 }
 0x257   : > { %v1608_v39 = vmul.f32 %v3370_v25, %v1532_v23  ;;  %v2480_v62 = vpop.eup %2479  ;;  %1937 = vst [vmem:[%s3386_s23 + $0x90] sm:$0xff] %v2220_v27  ;;  %v1701_v53 = vmul.f32 0.088388346, %v1637_v17  ;;  %v1449_v63 = vmul.f32 0.00390625, %v1398_v56  ;;  %v1434_v28 = vmul.f32 0.00390625, %v1353_v31 }
 0x258   : > { %v1404_v8 = vpop.xlane.xlu0 %1403  ;;  %v1359_v2 = vpop.xlane.xlu1 %1358  ;;  %v2205_v1 = vpack.c.bf16 %v1670_v38, %v1669_v20  ;;  %v1702_v5 = vmul.f32 0.088388346, %v1638_v52  ;;  %v1671_v10 = vmul.f32 0.088388346, %v1607_v34  ;;  %v1563_v18 = vmul.f32 %v2480_v62, %v3128_v3 }
 0x259   : > { %v1672_v14 = vmul.f32 0.088388346, %v1608_v39  ;;  %v1564_v36 = vmul.f32 %v2480_v62, %v3134_v12  ;;  %v1481_v6 = vadd.f32 1e-06, %v1449_v63  ;;  %v1466_v41 = vadd.f32 1e-06, %v1434_v28 }
 0x25a   : > { %v2482_v9 = vpop.eup %2481  ;;  %1922 = vst [vmem:[%s3386_s23 + $0x18] sm:$0xff] %v2205_v1  ;;  %v2221_v57 = vpack.c.bf16 %v1702_v5, %v1701_v53  ;;  %v1450_v56 = vmul.f32 0.00390625, %v1401_v48  ;;  %v1435_v31 = vmul.f32 0.00390625, %v1356_v35  ;;  %v1639_v60 = vmul.f32 %v3366_v30, %v1563_v18 }
 0x25b   : > { %v2206_v13 = vpack.c.bf16 %v1672_v14, %v1671_v10  ;;  %v1640_v47 = vmul.f32 %v3370_v25, %v1564_v36  ;;  %v1533_v59 = vmul.f32 %v2482_v9, %v3139_v19  ;;  %v1534_v3 = vmul.f32 %v2482_v9, %v3146_v26 }
 0x25c   : > { %v1407_v45 = vpop.xlane.xlu1 %1406  ;;  %v1362_v12 = vpop.xlane.xlu0 %1361  ;;  %1938 = vst [vmem:[%s3386_s23 + $0x98] sm:$0xff] %v2221_v57  ;;  %2487 = vrsqrt.f32 %v1481_v6  ;;  %v1482_v49 = vadd.f32 1e-06, %v1450_v56  ;;  %v1467_v23 = vadd.f32 1e-06, %v1435_v31  ;;  %v1451_v27 = vmul.f32 0.00390625, %v1404_v8 }
 0x25d   : > { %v2484_v24 = vpop.eup %2483  ;;  %1923 = vst [vmem:[%s3386_s23 + $0x20] sm:$0xff] %v2206_v13  ;;  %v1703_v20 = vmul.f32 0.088388346, %v1639_v60  ;;  %v1704_v48 = vmul.f32 0.088388346, %v1640_v47  ;;  %v1609_v35 = vmul.f32 %v3366_v30, %v1533_v59  ;;  %v1610_v17 = vmul.f32 %v3370_v25, %v1534_v3 }
 0x25e   : > { %v1565_v19 = vmul.f32 %v2484_v24, %v3151_v29  ;;  %v1566_v26 = vmul.f32 %v2484_v24, %v3158_v33  ;;  %2489 = vrsqrt.f32 %v1466_v41  ;;  %v1483_v21 = vadd.f32 1e-06, %v1451_v27 }
 0x25f   : > { %v2222_v38 = vpack.c.bf16 %v1704_v48, %v1703_v20  ;;  %v1673_v52 = vmul.f32 0.088388346, %v1609_v35  ;;  %v1674_v34 = vmul.f32 0.088388346, %v1610_v17  ;;  %2491 = vrsqrt.f32 %v1482_v49  ;;  %v2486_v8 = vpop.eup %2485 }
 0x260   : > { %v1410_v39 = vpop.xlane.xlu0 %1409  ;;  %v1365_v62 = vpop.xlane.xlu1 %1364  ;;  %v1641_v53 = vmul.f32 %v3366_v30, %v1565_v19  ;;  %v1642_v63 = vmul.f32 %v3370_v25, %v1566_v26  ;;  %2493 = vrsqrt.f32 %v1467_v23  ;;  %v1436_v28 = vmul.f32 0.00390625, %v1359_v2 }
 0x261   : > { %1939 = vst [vmem:[%s3386_s23 + $0xa0] sm:$0xff] %v2222_v38  ;;  %v2207_v29 = vpack.c.bf16 %v1674_v34, %v1673_v52  ;;  %2495 = vrsqrt.f32 %v1483_v21  ;;  %v1452_v33 = vmul.f32 0.00390625, %v1407_v45  ;;  %v1437_v1 = vmul.f32 0.00390625, %v1362_v12 }
 0x262   : > { %v1705_v5 = vmul.f32 0.088388346, %v1641_v53  ;;  %v1706_v10 = vmul.f32 0.088388346, %v1642_v63  ;;  %v1535_v14 = vmul.f32 %v2486_v8, %v3163_v43  ;;  %v1536_v18 = vmul.f32 %v2486_v8, %v3171_v50 }
 0x263   : > { %1924 = vst [vmem:[%s3386_s23 + $0x28] sm:$0xff] %v2207_v29  ;;  %v1468_v36 = vadd.f32 1e-06, %v1436_v28  ;;  %v1484_v6 = vadd.f32 1e-06, %v1452_v33  ;;  %v1453_v31 = vmul.f32 0.00390625, %v1410_v39 }
 0x264   : > { %v1469_v41 = vadd.f32 1e-06, %v1437_v1  ;;  %v1413_v9 = vpop.xlane.xlu1 %1412  ;;  %v1368_v57 = vpop.xlane.xlu0 %1367  ;;  %v2223_v2 = vpack.c.bf16 %v1706_v10, %v1705_v5  ;;  %v1611_v13 = vmul.f32 %v3366_v30, %v1535_v14  ;;  %v1612_v56 = vmul.f32 %v3370_v25, %v1536_v18 }
 0x265   : > { %2497 = vrsqrt.f32 %v1468_v36  ;;  %v1438_v60 = vmul.f32 0.00390625, %v1365_v62  ;;  %v1454_v47 = vmul.f32 0.00390625, %v1413_v9  ;;  %v1439_v59 = vmul.f32 0.00390625, %v1368_v57 }
 0x266   : > { %v2488_v43 = vpop.eup %2487  ;;  %1940 = vst [vmem:[%s3386_s23 + $0xa8] sm:$0xff] %v2223_v2  ;;  %v1675_v50 = vmul.f32 0.088388346, %v1611_v13  ;;  %v1676_v3 = vmul.f32 0.088388346, %v1612_v56  ;;  %2499 = vrsqrt.f32 %v1484_v6 }
 0x267   : > { %v1485_v45 = vadd.f32 1e-06, %v1453_v31  ;;  %v1567_v12 = vmul.f32 %v2488_v43, %v3166_v46  ;;  %v1568_v24 = vmul.f32 %v2488_v43, %v3174_v54  ;;  %2501 = vrsqrt.f32 %v1469_v41 }
 0x268   : > { %v1470_v49 = vadd.f32 1e-06, %v1438_v60  ;;  %v1416_v23 = vpop.xlane.xlu0 %1415  ;;  %v2490_v27 = vpop.eup %2489  ;;  %v2208_v20 = vpack.c.bf16 %v1676_v3, %v1675_v50  ;;  %v1486_v48 = vadd.f32 1e-06, %v1454_v47  ;;  %v3442_v35 = vadd.f32 1e-06, %v1439_v59 }
 0x269   : > { %2503 = vrsqrt.f32 %v1485_v45  ;;  %v2492_v17 = vpop.eup %2491  ;;  %v1643_v19 = vmul.f32 %v3366_v30, %v1567_v12  ;;  %v1644_v26 = vmul.f32 %v3370_v25, %v1568_v24  ;;  %v1537_v21 = vmul.f32 %v2490_v27, %v3179_v58  ;;  %v3453_v39 = vpop.xlane.xlu1 %1370  ;;  %v3669_v12 = vld [vmem:[#allocation17_spill] sm:$0xff] }
 0x26a   : > { %v1538_v46 = vmul.f32 %v2490_v27, %v3186_v0  ;;  %v2494_v38 = vpop.eup %2493  ;;  %1925 = vst [vmem:[%s3386_s23 + $0x30] sm:$0xff] %v2208_v20  ;;  %v1569_v54 = vmul.f32 %v2492_v17, %v3191_v11  ;;  %v1570_v52 = vmul.f32 %v2492_v17, %v3194_v15  ;;  %2505 = vrsqrt.f32 %v1470_v49  ;;  %v3670_v27 = vld [vmem:[#allocation19_spill] sm:$0xff] }
 0x26b   : > { %v3451_v34 = vmul.f32 0.00390625, %v1416_v23  ;;  %v2496_v62 = vpop.eup %2495  ;;  %v1707_v53 = vmul.f32 0.088388346, %v1643_v19  ;;  %v1708_v63 = vmul.f32 0.088388346, %v1644_v26  ;;  %v1613_v28 = vmul.f32 %v3366_v30, %v1537_v21  ;;  %v3671_v19 = vld [vmem:[#allocation18_spill] sm:$0xff] }
 0x26c   : > { %v1614_v58 = vmul.f32 %v3370_v25, %v1538_v46  ;;  %v1645_v0 = vmul.f32 %v3366_v30, %v1569_v54  ;;  %v1646_v8 = vmul.f32 %v3370_v25, %v1570_v52  ;;  %v1539_v11 = vmul.f32 %v2494_v38, %v3205_v32 }
 0x26d   : > { %v1540_v15 = vmul.f32 %v2494_v38, %v3211_v40  ;;  %v2224_v29 = vpack.c.bf16 %v1708_v63, %v1707_v53  ;;  %v1677_v33 = vmul.f32 0.088388346, %v1613_v28  ;;  %v1571_v5 = vmul.f32 %v2496_v62, %v3208_v37  ;;  %v1419_v56 = vpop.xlane.xlu1 %1418  ;;  %v3672_v53 = vld [vmem:[#allocation20_spill] sm:$0xff] }
 0x26e   : > { %v1678_v1 = vmul.f32 0.088388346, %v1614_v58  ;;  %v1709_v10 = vmul.f32 0.088388346, %v1645_v0  ;;  %v1710_v14 = vmul.f32 0.088388346, %v1646_v8  ;;  %v1615_v18 = vmul.f32 %v3366_v30, %v1539_v11 }
 0x26f   : > { %v1616_v36 = vmul.f32 %v3370_v25, %v1540_v15  ;;  %v2498_v6 = vpop.eup %2497  ;;  %1941 = vst [vmem:[%s3386_s23 + $0xb0] sm:$0xff] %v2224_v29  ;;  %v1572_v9 = vmul.f32 %v2496_v62, %v3214_v44  ;;  %v1647_v32 = vmul.f32 %v3366_v30, %v1571_v5  ;;  %2507 = vrsqrt.f32 %v1486_v48  ;;  %v3673_v11 = vld [vmem:[#allocation21_spill] sm:$0xff] }
 0x270   : > { %v2209_v41 = vpack.c.bf16 %v1678_v1, %v1677_v33  ;;  %v2500_v40 = vpop.eup %2499  ;;  %v2225_v57 = vpack.c.bf16 %v1710_v14, %v1709_v10  ;;  %v1679_v2 = vmul.f32 0.088388346, %v1615_v18  ;;  %v1541_v13 = vmul.f32 %v2498_v6, %v3219_v55 }
 0x271   : > { %v1680_v37 = vmul.f32 0.088388346, %v1616_v36  ;;  %v2502_v31 = vpop.eup %2501  ;;  %v1648_v60 = vmul.f32 %v3370_v25, %v1572_v9  ;;  %v1711_v47 = vmul.f32 0.088388346, %v1647_v32  ;;  %v1542_v59 = vmul.f32 %v2498_v6, %v3226_v61  ;;  %v1377_v58 = vpop.xlane.xlu1 %1376  ;;  %v3674_v9 = vld [vmem:[#allocation22_spill] sm:$0xff]  ;;  %v3675_v32 = vld [vmem:[#allocation23_spill] sm:$0xff] }
 0x272   : > { %1926 = vst [vmem:[%s3386_s23 + $0x38] sm:$0xff] %v2209_v41  ;;  %v1573_v44 = vmul.f32 %v2500_v40, %v3231_v7  ;;  %1942 = vst [vmem:[%s3386_s23 + $0xb8] sm:$0xff] %v2225_v57  ;;  %v1617_v3 = vmul.f32 %v3366_v30, %v1541_v13  ;;  %v1574_v45 = vmul.f32 %v2500_v40, %v3238_v22  ;;  %v1374_v22 = vpop.xlane.xlu0 %1373  ;;  %2509 = vrsqrt.f32 %v3442_v35 }
 0x273   : > { %v2504_v43 = vpop.eup %2503  ;;  %v2210_v50 = vpack.c.bf16 %v1680_v37, %v1679_v2  ;;  %v1543_v55 = vmul.f32 %v2502_v31, %v3669_v12  ;;  %v1712_v24 = vmul.f32 0.088388346, %v1648_v60  ;;  %v1618_v49 = vmul.f32 %v3370_v25, %v1542_v59 }
 0x274   : > { %v1649_v23 = vmul.f32 %v3366_v30, %v1573_v44  ;;  %v1544_v20 = vmul.f32 %v2502_v31, %v3670_v27  ;;  %v2506_v48 = vpop.eup %2505  ;;  %v1681_v61 = vmul.f32 0.088388346, %v1617_v3  ;;  %v1650_v7 = vmul.f32 %v3370_v25, %v1574_v45 }
 0x275   : > { %1927 = vst [vmem:[%s3386_s23 + $0x40] sm:$0xff] %v2210_v50  ;;  %v1619_v17 = vmul.f32 %v3366_v30, %v1543_v55  ;;  %v1575_v26 = vmul.f32 %v2504_v43, %v3671_v19  ;;  %v2226_v21 = vpack.c.bf16 %v1712_v24, %v1711_v47  ;;  %v1682_v46 = vmul.f32 0.088388346, %v1618_v49  ;;  %v1425_v59 = vpop.xlane.xlu1 %1424 }
 0x276   : > { %v1713_v38 = vmul.f32 0.088388346, %v1649_v23  ;;  %v1620_v54 = vmul.f32 %v3370_v25, %v1544_v20  ;;  %v1714_v52 = vmul.f32 0.088388346, %v1650_v7  ;;  %v1576_v63 = vmul.f32 %v2504_v43, %v3672_v53  ;;  %v1422_v2 = vpop.xlane.xlu0 %1421  ;;  %v3677_v7 = vld [vmem:[#allocation26_spill] sm:$0xff] }
 0x277   : > { %v1683_v62 = vmul.f32 0.088388346, %v1619_v17  ;;  %v1651_v28 = vmul.f32 %v3366_v30, %v1575_v26  ;;  %1943 = vst [vmem:[%s3386_s23 + $0xc0] sm:$0xff] %v2226_v21  ;;  %v2211_v0 = vpack.c.bf16 %v1682_v46, %v1681_v61  ;;  %v1545_v15 = vmul.f32 %v2506_v48, %v3673_v11  ;;  %v3678_v21 = vld [vmem:[#allocation25_spill] sm:$0xff]  ;;  %v3680_v11 = vld [vmem:[#allocation28_spill] sm:$0xff] }
 0x278   : > { %v1684_v8 = vmul.f32 0.088388346, %v1620_v54  ;;  %v1546_v29 = vmul.f32 %v2506_v48, %v3266_v4  ;;  %v2227_v33 = vpack.c.bf16 %v1714_v52, %v1713_v38  ;;  %v1652_v1 = vmul.f32 %v3370_v25, %v1576_v63  ;;  %v3676_v48 = vld [vmem:[#allocation24_spill] sm:$0xff]  ;;  %v3679_v38 = vld [vmem:[#allocation27_spill] sm:$0xff] }
 0x279   : > { %v1715_v5 = vmul.f32 0.088388346, %v1651_v28  ;;  %v2508_v10 = vpop.eup %2507  ;;  %1928 = vst [vmem:[%s3386_s23 + $0x48] sm:$0xff] %v2211_v0  ;;  %v1621_v18 = vmul.f32 %v3366_v30, %v1545_v15  ;;  %v1487_v6 = vadd.f32 1e-06, %v3451_v34  ;;  %v1440_v57 = vmul.f32 0.00390625, %v3453_v39 }
 0x27a   : > { %v2212_v14 = vpack.c.bf16 %v1684_v8, %v1683_v62  ;;  %v1622_v36 = vmul.f32 %v3370_v25, %v1546_v29  ;;  %1944 = vst [vmem:[%s3386_s23 + $0xc8] sm:$0xff] %v2227_v33  ;;  %v1716_v41 = vmul.f32 0.088388346, %v1652_v1  ;;  %v1577_v4 = vmul.f32 %v2508_v10, %v3674_v9  ;;  %v3681_v1 = vld [vmem:[#allocation29_spill] sm:$0xff] }
 0x27b   : > { %v1578_v40 = vmul.f32 %v2508_v10, %v3675_v32  ;;  %v1685_v35 = vmul.f32 0.088388346, %v1621_v18  ;;  %2511 = vrsqrt.f32 %v1487_v6  ;;  %v1456_v13 = vmul.f32 0.00390625, %v1419_v56  ;;  %v3682_v10 = vld [vmem:[#allocation30_spill] sm:$0xff]  ;;  %v3683_v32 = vld [vmem:[#allocation31_spill] sm:$0xff] }
 0x27c   : > { %1929 = vst [vmem:[%s3386_s23 + $0x50] sm:$0xff] %v2212_v14  ;;  %v1686_v37 = vmul.f32 0.088388346, %v1622_v36  ;;  %v2228_v31 = vpack.c.bf16 %v1716_v41, %v1715_v5  ;;  %v1653_v60 = vmul.f32 %v3366_v30, %v1577_v4  ;;  %v1472_v47 = vadd.f32 1e-06, %v1440_v57  ;;  %v2510_v20 = vpop.eup %2509 }
 0x27d   : > { %v1654_v34 = vmul.f32 %v3370_v25, %v1578_v40  ;;  %v1488_v43 = vadd.f32 1e-06, %v1456_v13  ;;  %v1441_v50 = vmul.f32 0.00390625, %v1374_v22  ;;  %v1457_v3 = vmul.f32 0.00390625, %v1422_v2 }
 0x27e   : > { %v2213_v44 = vpack.c.bf16 %v1686_v37, %v1685_v35  ;;  %1945 = vst [vmem:[%s3386_s23 + $0xd0] sm:$0xff] %v2228_v31  ;;  %v1717_v39 = vmul.f32 0.088388346, %v1653_v60  ;;  %2513 = vrsqrt.f32 %v1472_v47  ;;  %v1442_v12 = vmul.f32 0.00390625, %v1377_v58  ;;  %v3684_v37 = vld [vmem:[#allocation33_spill] sm:$0xff]  ;;  %v3685_v31 = vld [vmem:[#allocation32_spill] sm:$0xff] }
 0x27f   : > { %v1718_v45 = vmul.f32 0.088388346, %v1654_v34  ;;  %2515 = vrsqrt.f32 %v1488_v43  ;;  %v1473_v56 = vadd.f32 1e-06, %v1441_v50  ;;  %v1489_v55 = vadd.f32 1e-06, %v1457_v3 }
 0x280   : > { %1930 = vst [vmem:[%s3386_s23 + $0x58] sm:$0xff] %v2213_v44  ;;  %v1458_v24 = vmul.f32 0.00390625, %v1425_v59  ;;  %v1474_v23 = vadd.f32 1e-06, %v1442_v12  ;;  %v1547_v61 = vmul.f32 %v2510_v20, %v3676_v48  ;;  %v1548_v17 = vmul.f32 %v2510_v20, %v3677_v7  ;;  %v3686_v43 = vld [vmem:[#allocation34_spill] sm:$0xff]  ;;  %v3687_v12 = vld [vmem:[#allocation35_spill] sm:$0xff] }
 0x281   : > { %v2229_v49 = vpack.c.bf16 %v1718_v45, %v1717_v39  ;;  %2517 = vrsqrt.f32 %v1473_v56 }
 0x282   : > { %v1490_v27 = vadd.f32 1e-06, %v1458_v24  ;;  %2519 = vrsqrt.f32 %v1489_v55  ;;  %v1623_v26 = vmul.f32 %v3366_v30, %v1547_v61  ;;  %v1624_v22 = vmul.f32 %v3370_v25, %v1548_v17 }
 0x283   : > { %1946 = vst [vmem:[%s3386_s23 + $0xd8] sm:$0xff] %v2229_v49  ;;  %2521 = vrsqrt.f32 %v1474_v23  ;;  %v3688_v23 = vld [vmem:[#allocation36_spill] sm:$0xff] }
 0x284   : > { %2523 = vrsqrt.f32 %v1490_v27  ;;  %v1687_v52 = vmul.f32 0.088388346, %v1623_v26  ;;  %v1688_v62 = vmul.f32 0.088388346, %v1624_v22 }
 0x285   : > { %v2512_v19 = vpop.eup %2511 }
 0x286   : > { %v1579_v46 = vmul.f32 %v2512_v19, %v3678_v21  ;;  %v1580_v54 = vmul.f32 %v2512_v19, %v3679_v38  ;;  %v2214_v0 = vpack.c.bf16 %v1688_v62, %v1687_v52 }
 0x288   : > { %v2514_v53 = vpop.eup %2513  ;;  %v1655_v63 = vmul.f32 %v3366_v30, %v1579_v46  ;;  %v1656_v28 = vmul.f32 %v3370_v25, %v1580_v54  ;;  %1931 = vst [vmem:[%s3386_s23 + $0x60] sm:$0xff] %v2214_v0 }
 0x289   : > { %v2516_v58 = vpop.eup %2515  ;;  %v1549_v8 = vmul.f32 %v2514_v53, %v3299_v51  ;;  %v1550_v15 = vmul.f32 %v2514_v53, %v3680_v11 }
 0x28a   : > { %v1719_v29 = vmul.f32 0.088388346, %v1655_v63  ;;  %v1720_v33 = vmul.f32 0.088388346, %v1656_v28  ;;  %v1581_v5 = vmul.f32 %v2516_v58, %v3681_v1  ;;  %v1582_v14 = vmul.f32 %v2516_v58, %v3682_v10 }
 0x28b   : > { %v2518_v18 = vpop.eup %2517  ;;  %v1625_v36 = vmul.f32 %v3366_v30, %v1549_v8  ;;  %v1626_v6 = vmul.f32 %v3370_v25, %v1550_v15 }
 0x28c   : > { %v2520_v41 = vpop.eup %2519  ;;  %v2230_v9 = vpack.c.bf16 %v1720_v33, %v1719_v29  ;;  %v1657_v4 = vmul.f32 %v3366_v30, %v1581_v5  ;;  %v1658_v51 = vmul.f32 %v3370_v25, %v1582_v14  ;;  %v1551_v40 = vmul.f32 %v2518_v18, %v3683_v32 }
 0x28d   : > { %v2522_v57 = vpop.eup %2521  ;;  %v1689_v2 = vmul.f32 0.088388346, %v1625_v36  ;;  %v1690_v35 = vmul.f32 0.088388346, %v1626_v6  ;;  %v1552_v13 = vmul.f32 %v2518_v18, %v3684_v37  ;;  %v1583_v60 = vmul.f32 %v2520_v41, %v3685_v31 }
 0x28e   : > { %v2524_v34 = vpop.eup %2523  ;;  %1947 = vst [vmem:[%s3386_s23 + $0xe0] sm:$0xff] %v2230_v9  ;;  %v1721_v47 = vmul.f32 0.088388346, %v1657_v4  ;;  %v1722_v59 = vmul.f32 0.088388346, %v1658_v51  ;;  %v1627_v44 = vmul.f32 %v3366_v30, %v1551_v40  ;;  %v1584_v50 = vmul.f32 %v2520_v41, %v3686_v43 }
 0x28f   : > { %v2215_v3 = vpack.c.bf16 %v1690_v35, %v1689_v2  ;;  %v1628_v39 = vmul.f32 %v3370_v25, %v1552_v13  ;;  %v1659_v45 = vmul.f32 %v3366_v30, %v1583_v60  ;;  %v1553_v56 = vmul.f32 %v2522_v57, %v3687_v12 }
 0x290   : > { %v2231_v55 = vpack.c.bf16 %v1722_v59, %v1721_v47  ;;  %v1691_v24 = vmul.f32 0.088388346, %v1627_v44  ;;  %v1660_v49 = vmul.f32 %v3370_v25, %v1584_v50  ;;  %v1554_v27 = vmul.f32 %v2522_v57, %v3688_v23 }
 0x291   : > { %1932 = vst [vmem:[%s3386_s23 + $0x68] sm:$0xff] %v2215_v3  ;;  %v1692_v20 = vmul.f32 0.088388346, %v1628_v39  ;;  %v1723_v48 = vmul.f32 0.088388346, %v1659_v45  ;;  %v1629_v61 = vmul.f32 %v3366_v30, %v1553_v56  ;;  %v1585_v7 = vmul.f32 %v2524_v34, %v3344_v42 }
 0x292   : > { %1948 = vst [vmem:[%s3386_s23 + $0xe8] sm:$0xff] %v2231_v55  ;;  %v1724_v17 = vmul.f32 0.088388346, %v1660_v49  ;;  %v1630_v19 = vmul.f32 %v3370_v25, %v1554_v27  ;;  %v1586_v26 = vmul.f32 %v2524_v34, %v3354_v16 }
 0x293   : > { %v2216_v22 = vpack.c.bf16 %v1692_v20, %v1691_v24  ;;  %v1693_v21 = vmul.f32 0.088388346, %v1629_v61  ;;  %v1661_v46 = vmul.f32 %v3366_v30, %v1585_v7 }
 0x294   : > { %v2232_v38 = vpack.c.bf16 %v1724_v17, %v1723_v48  ;;  %v1694_v54 = vmul.f32 0.088388346, %v1630_v19  ;;  %v1662_v52 = vmul.f32 %v3370_v25, %v1586_v26 }
 0x295   : > { %1933 = vst [vmem:[%s3386_s23 + $0x70] sm:$0xff] %v2216_v22  ;;  %v1725_v42 = vmul.f32 0.088388346, %v1661_v46 }
 0x296   : > { %1949 = vst [vmem:[%s3386_s23 + $0xf0] sm:$0xff] %v2232_v38  ;;  %v2217_v62 = vpack.c.bf16 %v1694_v54, %v1693_v21  ;;  %v1726_v53 = vmul.f32 0.088388346, %v1662_v52 }
 0x298   : > { %1934 = vst [vmem:[%s3386_s23 + $0x78] sm:$0xff] %v2217_v62  ;;  %v2233_v16 = vpack.c.bf16 %v1726_v53, %v1725_v42 }
 0x29a   : > { %1950 = vst [vmem:[%s3386_s23 + $0xf8] sm:$0xff] %v2233_v16 }
 0x29b   : > { %2652 = shalt.err (!%p2649_p0)
}
 0x29c   : > { %s2653_s28 = scalar_lea.hbm %s3548_s24, 4096  ;;  %s2657_s12 = scalar_lea.hbm %s3605_s4, 8192 }
 0x29d   : > { %p2654_p4 = scmp.ne.s32.totalorder %s3548_s24, %s2653_s28  ;;  %p2658_p12 = scmp.lt.u32.totalorder %s3548_s24, %s3605_s4 }
 0x29e   : > { %p2659_p1 = scmp.lt.u32.totalorder %s2657_s12, %s2653_s28  ;;  %p2661_p13 = scmp.lt.u32.totalorder %s2653_s28, %s3548_s24 }
 0x29f   : > { %p2655_p2 = pnand %p2654_p4, %p2919_p10 }
 0x2a0   : > { %p2660_p11 = por %p2659_p1, %p2658_p12 }
 0x2a1   : > { %p2656_p8 = pneg %p2655_p2 }
 0x2a2   : > { %p2662_p6 = por %p2661_p13, %p2660_p11 }
 0x2a4   : > { %p2663_p3 = pnand %p2662_p6, %p2656_p8 }
 0x2a6   : > { %2666 = shalt.err (!%p2663_p3)
}
 0x2a7   : > { %s2738_s23 = smov 128   ;;  %s2739_s25 = smov 8  }
 0x2a8   : > { %2282 = dma.vmem_to_hbm [thread:$0]  (%p2919_p10), %s3550_s27, 4096, %s3548_s24, %s1952_s18, %s2738_s23, %s2738_s23, %s2739_s25  }
 0x2a9 PF: > { %s3689_s5 = sld [smem:[#allocation16_spill]]  ;;  %s1981_s7 = sand.u32 1, %s2709_s15  }
 0x2aa   : > { %p3691_p7 = scmp.ge.s32.totalorder %s2729_s20, 2  ;;  %s1982_s29 = scalar_lea.sflag [#allocation5], %s1981_s7 }
 0x2af   : > { %p3690_p5 = scmp.ne.s32.totalorder %s3689_s5, 0 }
 0x2b1   : > { %p2299_p9 = pnand %p3691_p7, %p3690_p5 }
 0x2b3   : > { %2704 = dma.done.wait (!%p2299_p9), %s1982_s29, 4096  }
 0x2b4   : > { %2706 = vsyncadd (!%p2299_p9), %s1982_s29, 4294963200  ;;  %s22_s20 = sadd.s32 1, %s2729_s20   ;;  %s3692_s15 = smov %s2713_s16 }
 0x2b5   : > { %p19_p0 = scmp.ge.s32.totalorder %s22_s20, 4   ;;  %s3693_s16 = smov %s2717_s17 }
 0x2b6   : > { %s3694_s17 = smov %s2931_s13  ;;  %s3695_s18 = smov %s2725_s19 }
 0x2b7   : > { %s3696_s19 = smov %s3698_s9  ;;  %21 = sbr.rel (!%p19_p0) target bundleno = 8 (0x8), region = 102 }
 0x2be   :  { %1987 = vsyncpa [#allocation4], 1 }
 0x2bf   :  { %1989 = vsyncpa [#allocation4 + $0x1], 1 }
 0x2c0   :  { %1990 = vsyncpa [#allocation7], 1 }
 0x2c1   :  { %1991 = vsyncpa [#allocation10], 1 }
 0x2c2   :  { %1992 = vsyncpa [#allocation5], 1 }
 0x2c3   :  { %1994 = vsyncpa [#allocation5 + $0x1], 1 }

</bundles_post_ra>
